<compile_context>
chip_gen: v6e
topology: v6e:2x2x1
jax: 0.10.0
libtpu: 0.0.40
codegen_flags: <defaults>
</compile_context>

<pallas_src>
import functools
import math

import jax
import jax.numpy as jnp
from jax import lax
from jax.experimental import pallas as pl
from jax.experimental.pallas import tpu as pltpu

KERNEL = 4
STRIDE = 2
PADDING = 1
BN_EPS = 1e-5

TM = 256                        # row tile for every tiled pass (multiple of 16, /g >= 8)
LANES = 128
VMEM_LIMIT = 64 * 1024 * 1024   # fits v7x physical VMEM, above its 32 MiB scoped default


def _mosaic_params(n_axes=1):
    return pltpu.CompilerParams(
        dimension_semantics=("parallel",) * n_axes,
        vmem_limit_bytes=VMEM_LIMIT)


def _lane_group(n):
    """How many row blocks get folded into the 128-lane dim (1 = already lane dense)."""
    if n >= LANES or LANES % n != 0:
        return 1
    return LANES // n


def _lane_pack(y, g):
    """(tm, n) -> (tm//g, g*n): g contiguous row blocks concatenated along lanes."""
    if g == 1:
        return y
    tm, n = y.shape
    rows = tm // g
    pieces = [y[j * rows:(j + 1) * rows, :] for j in range(g)]
    return jnp.concatenate(pieces, axis=-1)


def _lane_unpack(yp, m_pad, n, g):
    """Wrapper-side inverse of the in-kernel lane packing (layout plumbing only)."""
    if g == 1:
        return yp
    rows = TM // g
    ntiles = m_pad // TM
    y = yp.reshape(ntiles, rows, g, n).transpose(0, 2, 1, 3)
    return y.reshape(m_pad, n)


# --------------------------------------------------------------------------- #
# Pallas kernels                                                              #
# --------------------------------------------------------------------------- #
def _linear_kernel(z_ref, w_ref, b_ref, o_ref):
    y = jnp.dot(z_ref[...], w_ref[...], preferred_element_type=jnp.float32)
    o_ref[...] = (y + b_ref[...]).astype(o_ref.dtype)


def _convt_mm_stats_kernel(x_ref, w_ref, rf_ref, cs_ref, y_ref, st_ref, *, lane_group):
    # Sub-pixel ConvTranspose GEMM: (tm, 8*Cin) bf16 @ (8*Cin, 8*Cout) bf16 -> f32.
    y = jnp.dot(x_ref[...], w_ref[...], preferred_element_type=jnp.float32)
    # BatchNorm batch statistics, masked to sub-voxels inside the output volume
    # (border windows each produce one out-of-range sub-voxel per touching dim).
    viol = jnp.dot(rf_ref[...], cs_ref[...], preferred_element_type=jnp.float32)
    msk = jnp.where(viol < 0.5, 1.0, 0.0)
    ym = y * msk
    s1 = jnp.sum(ym, axis=0, keepdims=True)        # (1, N)  masked sum
    s2 = jnp.sum(ym * y, axis=0, keepdims=True)    # (1, N)  masked sum of squares
    n = y.shape[1]
    st_ref[...] = jnp.concatenate([s1, s2, jnp.zeros((6, n), jnp.float32)], axis=0)
    # Lane-dense store of the pre-BN activations (packed when N < 128).
    y_ref[...] = _lane_pack(y, lane_group)


def _scale_shift_relu_kernel(y_ref, sc_ref, sh_ref, o_ref):
    o_ref[...] = jnp.maximum(y_ref[...] * sc_ref[...] + sh_ref[...], 0.0).astype(o_ref.dtype)


def _convt_bias_sigmoid_kernel(x_ref, w_ref, b_ref, o_ref, *, lane_group):
    y = jnp.dot(x_ref[...], w_ref[...], preferred_element_type=jnp.float32)
    y = _lane_pack(y, lane_group)
    o_ref[...] = jax.nn.sigmoid(y + b_ref[...])


# --------------------------------------------------------------------------- #
# Sub-pixel ConvTranspose3d glue (plain JAX, no structural zeros)             #
# --------------------------------------------------------------------------- #
def _subpixel_patches(x):
    """x (B, D, H, W, C) -> bf16 patches (B*(D+1)*(H+1)*(W+1), 8*C), K order (id,ih,iw,c)."""
    B, D, H, W, C = x.shape
    xp = jnp.pad(x, ((0, 0), (1, 1), (1, 1), (1, 1), (0, 0)))
    wins = []
    for id_ in range(2):
        for ih in range(2):
            for iw in range(2):
                wins.append(xp[:, id_:id_ + D + 1, ih:ih + H + 1, iw:iw + W + 1, :])
    p = jnp.concatenate(wins, axis=-1)                       # (B, D+1, H+1, W+1, 8C)
    M = B * (D + 1) * (H + 1) * (W + 1)
    return p.reshape(M, 8 * C).astype(jnp.bfloat16), M


def _subpixel_weight(w):
    """PyTorch ConvTranspose3d weight (Cin, Cout, 4,4,4) -> (8*Cin, 8*Cout) GEMM matrix.

    Window (sd,sh,sw) with sub-voxel (td,th,tw) lands at output (2*sd+td-1, ...); the
    tap for window offset i and sub-voxel parity t along a dim is k = 2*(1-i)+t.
    """
    k_blocks = []
    for id_ in range(2):
        for ih in range(2):
            for iw in range(2):
                n_blocks = []
                for td in range(2):
                    for th in range(2):
                        for tw in range(2):
                            kd = 2 * (1 - id_) + td
                            kh = 2 * (1 - ih) + th
                            kw = 2 * (1 - iw) + tw
                            n_blocks.append(w[:, :, kd, kh, kw])          # (Cin, Cout)
                k_blocks.append(jnp.concatenate(n_blocks, axis=1))        # (Cin, 8*Cout)
    return jnp.concatenate(k_blocks, axis=0)                              # (8*Cin, 8*Cout)


def _colsel(cout):
    """(8, 8*cout) selector rows [td==0, td==1, th==0, th==1, tw==0, tw==1, 0, 0]."""
    idx = jnp.arange(8 * cout)
    td = (idx // (4 * cout)) % 2
    th = (idx // (2 * cout)) % 2
    tw = (idx // cout) % 2
    z = jnp.zeros_like(td)
    rows = [td == 0, td == 1, th == 0, th == 1, tw == 0, tw == 1, z > 0, z > 0]
    return jnp.stack(rows, axis=0).astype(jnp.float32)


def _border_rowflags(B, D, H, W, m_pad):
    """(m_pad, 8) per-window flags [sd==0, sd==D, sh==0, sh==H, sw==0, sw==W, 0, 0]."""
    shape = (B, D + 1, H + 1, W + 1)
    sd = jnp.arange(D + 1)[None, :, None, None]
    sh = jnp.arange(H + 1)[None, None, :, None]
    sw = jnp.arange(W + 1)[None, None, None, :]
    flags = [sd == 0, sd == D, sh == 0, sh == H, sw == 0, sw == W]
    flags = [jnp.broadcast_to(f, shape) for f in flags]
    flags += [jnp.zeros(shape, bool), jnp.zeros(shape, bool)]
    rf = jnp.stack(flags, axis=-1).astype(jnp.float32).reshape(-1, 8)
    return jnp.pad(rf, ((0, m_pad - rf.shape[0]), (0, 0)))


def _pixel_shuffle(y, B, D, H, W, cout):
    """(M, 8*cout) window outputs -> (B, 2D, 2H, 2W, cout) voxel grid."""
    y = y.reshape(B, D + 1, H + 1, W + 1, 2, 2, 2, cout)
    y = y.transpose(0, 1, 4, 2, 5, 3, 6, 7)
    y = y.reshape(B, 2 * D + 2, 2 * H + 2, 2 * W + 2, cout)
    return y[:, 1:-1, 1:-1, 1:-1, :]


# --------------------------------------------------------------------------- #
# Layer wrappers                                                              #
# --------------------------------------------------------------------------- #
def _linear(z, wt, b):
    M, N = z.shape[0], wt.shape[1]
    return pl.pallas_call(
        _linear_kernel,
        out_shape=jax.ShapeDtypeStruct((M, N), jnp.float32),
        compiler_params=pltpu.CompilerParams(vmem_limit_bytes=VMEM_LIMIT),
    )(z, wt, b)


def _convt_bn_relu(x, layer):
    B, D, H, W, _ = x.shape
    cout = layer["gamma"].shape[0]
    N = 8 * cout
    g = _lane_group(N)
    wp = g * N
    patches, M = _subpixel_patches(x)
    K = patches.shape[1]
    m_pad = ((M + TM - 1) // TM) * TM
    patches = jnp.pad(patches, ((0, m_pad - M), (0, 0)))
    rowflags = _border_rowflags(B, D, H, W, m_pad)
    ntiles = m_pad // TM

    # Pass 1: tiled matmul + per-tile masked partial BN statistics ("parallel" grid).
    y_packed, stats = pl.pallas_call(
        functools.partial(_convt_mm_stats_kernel, lane_group=g),
        grid=(ntiles,),
        in_specs=[
            pl.BlockSpec((TM, K), lambda i: (i, 0)),
            pl.BlockSpec((K, N), lambda i: (0, 0)),
            pl.BlockSpec((TM, 8), lambda i: (i, 0)),
            pl.BlockSpec((8, N), lambda i: (0, 0)),
        ],
        out_specs=[
            pl.BlockSpec((TM // g, wp), lambda i: (i, 0)),
            pl.BlockSpec((8, N), lambda i: (i, 0)),
        ],
        out_shape=[
            jax.ShapeDtypeStruct((m_pad // g, wp), jnp.float32),
            jax.ShapeDtypeStruct((ntiles * 8, N), jnp.float32),
        ],
        compiler_params=_mosaic_params(),
    )(patches, layer["wmat"], rowflags, layer["colsel"])

    # BatchNorm3d training-mode statistics (biased variance), f32 reduction.
    s = stats.reshape(ntiles, 8, N)[:, :2, :].sum(axis=0)       # (2, N)
    s = s.reshape(2, 8, cout).sum(axis=1)                       # (2, cout)
    count = float(B * (2 * D) * (2 * H) * (2 * W))
    mean = s[0] / count
    var = s[1] / count - mean * mean
    scale_c = layer["gamma"] * lax.rsqrt(var + BN_EPS)
    shift_c = layer["beta"] - mean * scale_c
    scale = jnp.tile(jnp.tile(scale_c, 8), g)[None, :]          # (1, wp), matches packing
    shift = jnp.tile(jnp.tile(shift_c, 8), g)[None, :]

    # Pass 2: lane-dense per-channel scale/shift + ReLU, bf16 out for the next GEMM.
    act = pl.pallas_call(
        _scale_shift_relu_kernel,
        grid=(ntiles,),
        in_specs=[
            pl.BlockSpec((TM // g, wp), lambda i: (i, 0)),
            pl.BlockSpec((1, wp), lambda i: (0, 0)),
            pl.BlockSpec((1, wp), lambda i: (0, 0)),
        ],
        out_specs=pl.BlockSpec((TM // g, wp), lambda i: (i, 0)),
        out_shape=jax.ShapeDtypeStruct((m_pad // g, wp), jnp.bfloat16),
        compiler_params=_mosaic_params(),
    )(y_packed, scale, shift)

    act = _lane_unpack(act, m_pad, N, g)[:M]
    return _pixel_shuffle(act, B, D, H, W, cout)


def _convt_sigmoid(x, layer):
    B, D, H, W, _ = x.shape
    wmat = layer["wmat"]
    N = wmat.shape[1]
    cout = N // 8
    g = _lane_group(N)
    wp = g * N
    patches, M = _subpixel_patches(x)
    K = patches.shape[1]
    m_pad = ((M + TM - 1) // TM) * TM
    patches = jnp.pad(patches, ((0, m_pad - M), (0, 0)))
    ntiles = m_pad // TM

    y = pl.pallas_call(
        functools.partial(_convt_bias_sigmoid_kernel, lane_group=g),
        grid=(ntiles,),
        in_specs=[
            pl.BlockSpec((TM, K), lambda i: (i, 0)),
            pl.BlockSpec((K, N), lambda i: (0, 0)),
            pl.BlockSpec((1, wp), lambda i: (0, 0)),
        ],
        out_specs=pl.BlockSpec((TM // g, wp), lambda i: (i, 0)),
        out_shape=jax.ShapeDtypeStruct((m_pad // g, wp), jnp.float32),
        compiler_params=_mosaic_params(),
    )(patches, wmat, layer["bias_p"])

    y = _lane_unpack(y, m_pad, N, g)[:M]
    return _pixel_shuffle(y, B, D, H, W, cout)


# --------------------------------------------------------------------------- #
# Forward pass                                                                #
# --------------------------------------------------------------------------- #
def prepare_params(params):
    """One-time conversion of raw parameters into matmul-ready (bf16) matrices."""
    prepared = {
        "proj_wt": params["proj_w"].T.astype(jnp.float32),
        "proj_b": params["proj_b"][None, :].astype(jnp.float32),
    }
    hidden = []
    for (w, b, gamma, beta) in params["hidden"]:
        del b  # ConvTranspose bias is exactly cancelled by the BatchNorm mean subtraction.
        hidden.append({
            "wmat": _subpixel_weight(w).astype(jnp.bfloat16),
            "gamma": gamma.astype(jnp.float32),
            "beta": beta.astype(jnp.float32),
            "colsel": _colsel(w.shape[1]),
        })
    prepared["hidden"] = hidden
    w, b = params["final"]
    N = 8 * w.shape[1]
    g = _lane_group(N)
    bias_n = jnp.tile(b.astype(jnp.float32), 8)        # per (td,th,tw,cout) column bias
    prepared["final"] = {
        "wmat": _subpixel_weight(w).astype(jnp.bfloat16),
        "bias_p": jnp.tile(bias_n, g)[None, :],
    }
    return prepared


def generator3d_forward(z, prepared):
    B = z.shape[0]
    feat0 = prepared["proj_wt"].shape[1] // 64
    h = _linear(z, prepared["proj_wt"], prepared["proj_b"])       # (B, feat0*64)
    x = h.reshape(B, feat0, 4, 4, 4).transpose(0, 2, 3, 4, 1)     # NDHWC
    for layer in prepared["hidden"]:
        x = _convt_bn_relu(x, layer)
    y = _convt_sigmoid(x, prepared["final"])                      # (B, V, V, V, 1)
    return y.transpose(0, 4, 1, 2, 3)                             # NCDHW


# --------------------------------------------------------------------------- #
# Deterministic parameter init (shapes implied by Generator3D.__init__)       #
# --------------------------------------------------------------------------- #
def init_params(key, latent_dim=32, output_size=16, feat_dims=(16, 8)):
    num_up = int(math.log2(output_size / 4))
    feat_dims = list(feat_dims)[:num_up]
    keys = iter(jax.random.split(key, 32))
    params = {"feat_dims": feat_dims}
    params["proj_w"] = 0.05 * jax.random.normal(next(keys), (feat_dims[0] * 64, latent_dim), jnp.float32)
    params["proj_b"] = 0.05 * jax.random.normal(next(keys), (feat_dims[0] * 64,), jnp.float32)
    hidden = []
    in_dim = feat_dims[0]
    for out_dim in feat_dims[1:]:
        w = 0.05 * jax.random.normal(next(keys), (in_dim, out_dim, KERNEL, KERNEL, KERNEL), jnp.float32)
        b = 0.05 * jax.random.normal(next(keys), (out_dim,), jnp.float32)
        gamma = 1.0 + 0.1 * jax.random.normal(next(keys), (out_dim,), jnp.float32)
        beta = 0.1 * jax.random.normal(next(keys), (out_dim,), jnp.float32)
        hidden.append((w, b, gamma, beta))
        in_dim = out_dim
    params["hidden"] = hidden
    w = 0.05 * jax.random.normal(next(keys), (in_dim, 1, KERNEL, KERNEL, KERNEL), jnp.float32)
    b = 0.05 * jax.random.normal(next(keys), (1,), jnp.float32)
    params["final"] = (w, b)
    return params


# --------------------------------------------------------------------------- #
# Pure-JAX reference for correctness check                                    #
# --------------------------------------------------------------------------- #
def _ref_conv_transpose3d(x, w, b):
    w_conv = jnp.flip(w, axis=(2, 3, 4)).transpose(1, 0, 2, 3, 4)  # (Cout, Cin, k, k, k)
    p = KERNEL - 1 - PADDING
    y = lax.conv_general_dilated(
        x, w_conv, window_strides=(1, 1, 1), padding=[(p, p)] * 3,
        lhs_dilation=(STRIDE,) * 3,
        dimension_numbers=("NCDHW", "OIDHW", "NCDHW"))
    return y + b[None, :, None, None, None]


def generator3d_reference(z, params):
    B = z.shape[0]
    x = (z @ params["proj_w"].T + params["proj_b"]).reshape(B, params["feat_dims"][0], 4, 4, 4)
    for (w, b, gamma, beta) in params["hidden"]:
        y = _ref_conv_transpose3d(x, w, b)
        mean = jnp.mean(y, axis=(0, 2, 3, 4), keepdims=True)
        var = jnp.mean((y - mean) ** 2, axis=(0, 2, 3, 4), keepdims=True)
        y = (y - mean) * lax.rsqrt(var + BN_EPS)
        y = y * gamma[None, :, None, None, None] + beta[None, :, None, None, None]
        x = jnp.maximum(y, 0.0)
    w, b = params["final"]
    return jax.nn.sigmoid(_ref_conv_transpose3d(x, w, b))


if __name__ == "__main__":
    key = jax.random.PRNGKey(0)
    pkey, zkey = jax.random.split(key)
    # Small config: latent_dim=32, output_size=16 -> 2 upsample layers, feat_dims=[16, 8]
    params = init_params(pkey, latent_dim=32, output_size=16, feat_dims=(16, 8))
    z = jax.random.normal(zkey, (2, 32), jnp.float32)

    prepared = prepare_params(params)
    fwd = jax.jit(generator3d_forward)
    out = jax.block_until_ready(fwd(z, prepared))
    assert out.shape == (2, 1, 16, 16, 16), out.shape

    ref = generator3d_reference(z, params)
    max_err = float(jnp.max(jnp.abs(out - ref)))
    assert max_err < 2e-2, f"mismatch vs reference: {max_err}"
    print("KERNEL_OK")
</pallas_src>

<mosaic_0001>
module attributes {stable_mosaic.version = 11 : i64} {
  func.func @_linear_kernel(%arg0: memref<2x32xf32, #tpu.memory_space<vmem>>, %arg1: memref<32x1024xf32, #tpu.memory_space<vmem>>, %arg2: memref<1x1024xf32, #tpu.memory_space<vmem>>, %arg3: memref<2x1024xf32, #tpu.memory_space<vmem>>) attributes {dimension_semantics = [], scalar_prefetch = 0 : i64, scratch_operands = 0 : i64, tpu.core_type = #tpu.core_type<tc>} {
    %c0 = arith.constant 0 : index
    %c0_0 = arith.constant 0 : index
    %0 = vector.load %arg0[%c0, %c0_0] : memref<2x32xf32, #tpu.memory_space<vmem>>, vector<2x32xf32>
    %c0_1 = arith.constant 0 : index
    %c0_2 = arith.constant 0 : index
    %1 = vector.load %arg1[%c0_1, %c0_2] : memref<32x1024xf32, #tpu.memory_space<vmem>>, vector<32x1024xf32>
    %cst = arith.constant dense<0.000000e+00> : vector<2x1024xf32>
    %2 = tpu.matmul %0, %1, %cst {dimension_numbers = #tpu.dot_dimension_numbers<[1], [0], [0], [1], [0, 0, 1, 1], [], []>} : vector<2x32xf32>, vector<32x1024xf32>, vector<2x1024xf32> -> vector<2x1024xf32>
    %c0_3 = arith.constant 0 : index
    %c0_4 = arith.constant 0 : index
    %3 = vector.load %arg2[%c0_3, %c0_4] : memref<1x1024xf32, #tpu.memory_space<vmem>>, vector<1x1024xf32>
    %4 = vector.broadcast %3 : vector<1x1024xf32> to vector<2x1024xf32>
    %5 = arith.addf %2, %4 : vector<2x1024xf32>
    %c0_5 = arith.constant 0 : index
    %c0_6 = arith.constant 0 : index
    %6 = vector.load %arg3[%c0_5, %c0_6] : memref<2x1024xf32, #tpu.memory_space<vmem>>, vector<2x1024xf32>
    tpu.vector_store %arg3[%c0_5, %c0_6], %5 {strides = array<i32>} : memref<2x1024xf32, #tpu.memory_space<vmem>>, vector<2x1024xf32>,
    return
  }
}

module attributes {stable_mosaic.version = 11 : i64} {
  func.func @_convt_mm_stats_kernel(%arg0: i32, %arg1: memref<256x128xbf16, #tpu.memory_space<vmem>>, %arg2: memref<128x64xbf16, #tpu.memory_space<vmem>>, %arg3: memref<256x8xf32, #tpu.memory_space<vmem>>, %arg4: memref<8x64xf32, #tpu.memory_space<vmem>>, %arg5: memref<128x128xf32, #tpu.memory_space<vmem>>, %arg6: memref<8x64xf32, #tpu.memory_space<vmem>>) attributes {dimension_semantics = [#tpu.dimension_semantics<parallel>], iteration_bounds = array<i64: 1>, scalar_prefetch = 0 : i64, scratch_operands = 0 : i64, tpu.core_type = #tpu.core_type<tc>, window_params = [{transform_indices = @transform_0, window_bounds = array<i64: 256, 128>}, {pipeline_mode = #tpu.pipeline_mode<synchronous>, transform_indices = @transform_1, window_bounds = array<i64: 128, 64>}, {transform_indices = @transform_2, window_bounds = array<i64: 256, 8>}, {pipeline_mode = #tpu.pipeline_mode<synchronous>, transform_indices = @transform_3, window_bounds = array<i64: 8, 64>}, {transform_indices = @transform_4, window_bounds = array<i64: 128, 128>}, {transform_indices = @transform_5, window_bounds = array<i64: 8, 64>}]} {
    %c0 = arith.constant 0 : index
    %c0_0 = arith.constant 0 : index
    %0 = vector.load %arg1[%c0, %c0_0] : memref<256x128xbf16, #tpu.memory_space<vmem>>, vector<256x128xbf16>
    %c0_1 = arith.constant 0 : index
    %c0_2 = arith.constant 0 : index
    %1 = vector.load %arg2[%c0_1, %c0_2] : memref<128x64xbf16, #tpu.memory_space<vmem>>, vector<128x64xbf16>
    %cst = arith.constant dense<0.000000e+00> : vector<256x64xf32>
    %2 = tpu.matmul %0, %1, %cst {dimension_numbers = #tpu.dot_dimension_numbers<[1], [0], [0], [1], [0, 0, 1, 1], [], []>} : vector<256x128xbf16>, vector<128x64xbf16>, vector<256x64xf32> -> vector<256x64xf32>
    %c0_3 = arith.constant 0 : index
    %c0_4 = arith.constant 0 : index
    %3 = vector.load %arg3[%c0_3, %c0_4] : memref<256x8xf32, #tpu.memory_space<vmem>>, vector<256x8xf32>
    %c0_5 = arith.constant 0 : index
    %c0_6 = arith.constant 0 : index
    %4 = vector.load %arg4[%c0_5, %c0_6] : memref<8x64xf32, #tpu.memory_space<vmem>>, vector<8x64xf32>
    %cst_7 = arith.constant dense<0.000000e+00> : vector<256x64xf32>
    %5 = tpu.matmul %3, %4, %cst_7 {dimension_numbers = #tpu.dot_dimension_numbers<[1], [0], [0], [1], [0, 0, 1, 1], [], []>} : vector<256x8xf32>, vector<8x64xf32>, vector<256x64xf32> -> vector<256x64xf32>
    %cst_8 = arith.constant 5.000000e-01 : f32
    %6 = vector.broadcast %cst_8 : f32 to vector<256x64xf32>
    %7 = arith.cmpf olt, %5, %6 : vector<256x64xf32>
    %cst_9 = arith.constant 1.000000e+00 : f32
    %cst_10 = arith.constant 0.000000e+00 : f32
    %8 = vector.broadcast %cst_9 : f32 to vector<256x64xf32>
    %9 = vector.broadcast %cst_10 : f32 to vector<256x64xf32>
    %10 = arith.select %7, %8, %9 : vector<256x64xi1>, vector<256x64xf32>
    %11 = arith.mulf %2, %10 : vector<256x64xf32>
    %cst_11 = arith.constant dense<0.000000e+00> : vector<64xf32>
    %12 = vector.multi_reduction <add>, %11, %cst_11 [0] : vector<256x64xf32> to vector<64xf32>
    %13 = vector.shape_cast %12 : vector<64xf32> to vector<1x64xf32>
    %14 = arith.mulf %11, %2 : vector<256x64xf32>
    %cst_12 = arith.constant dense<0.000000e+00> : vector<64xf32>
    %15 = vector.multi_reduction <add>, %14, %cst_12 [0] : vector<256x64xf32> to vector<64xf32>
    %16 = vector.shape_cast %15 : vector<64xf32> to vector<1x64xf32>
    %cst_13 = arith.constant 0.000000e+00 : f32
    %17 = vector.broadcast %cst_13 : f32 to vector<6x64xf32>
    %18 = tpu.concatenate %13, %16, %17 in 0 : vector<1x64xf32>, vector<1x64xf32>, vector<6x64xf32> -> vector<8x64xf32>
    %c0_14 = arith.constant 0 : index
    %c0_15 = arith.constant 0 : index
    %19 = vector.load %arg6[%c0_14, %c0_15] : memref<8x64xf32, #tpu.memory_space<vmem>>, vector<8x64xf32>
    tpu.vector_store %arg6[%c0_14, %c0_15], %18 {strides = array<i32>} : memref<8x64xf32, #tpu.memory_space<vmem>>, vector<8x64xf32>,
    %20 = vector.extract_strided_slice %2 {offsets = [0, 0], sizes = [128, 64], strides = [1, 1]} : vector<256x64xf32> to vector<128x64xf32>
    %21 = vector.extract_strided_slice %2 {offsets = [128, 0], sizes = [128, 64], strides = [1, 1]} : vector<256x64xf32> to vector<128x64xf32>
    %22 = tpu.concatenate %20, %21 in 1 : vector<128x64xf32>, vector<128x64xf32> -> vector<128x128xf32>
    %c0_16 = arith.constant 0 : index
    %c0_17 = arith.constant 0 : index
    %23 = vector.load %arg5[%c0_16, %c0_17] : memref<128x128xf32, #tpu.memory_space<vmem>>, vector<128x128xf32>
    tpu.vector_store %arg5[%c0_16, %c0_17], %22 {strides = array<i32>} : memref<128x128xf32, #tpu.memory_space<vmem>>, vector<128x128xf32>,
    return
  }
  func.func @transform_0(%arg0: i32) -> (i32, i32) {
    %c0_i32 = arith.constant 0 : i32
    %c0_i32_0 = arith.constant 0 : i32
    return %arg0, %c0_i32 : i32, i32
  }
  func.func @transform_1(%arg0: i32) -> (i32, i32) {
    %c0_i32 = arith.constant 0 : i32
    %c0_i32_0 = arith.constant 0 : i32
    %c0_i32_1 = arith.constant 0 : i32
    return %c0_i32, %c0_i32_0 : i32, i32
  }
  func.func @transform_2(%arg0: i32) -> (i32, i32) {
    %c0_i32 = arith.constant 0 : i32
    %c0_i32_0 = arith.constant 0 : i32
    return %arg0, %c0_i32 : i32, i32
  }
  func.func @transform_3(%arg0: i32) -> (i32, i32) {
    %c0_i32 = arith.constant 0 : i32
    %c0_i32_0 = arith.constant 0 : i32
    %c0_i32_1 = arith.constant 0 : i32
    return %c0_i32, %c0_i32_0 : i32, i32
  }
  func.func @transform_4(%arg0: i32) -> (i32, i32) {
    %c0_i32 = arith.constant 0 : i32
    %c0_i32_0 = arith.constant 0 : i32
    return %arg0, %c0_i32 : i32, i32
  }
  func.func @transform_5(%arg0: i32) -> (i32, i32) {
    %c0_i32 = arith.constant 0 : i32
    %c0_i32_0 = arith.constant 0 : i32
    return %arg0, %c0_i32 : i32, i32
  }
}

module attributes {stable_mosaic.version = 11 : i64} {
  func.func @_scale_shift_relu_kernel(%arg0: i32, %arg1: memref<128x128xf32, #tpu.memory_space<vmem>>, %arg2: memref<1x128xf32, #tpu.memory_space<vmem>>, %arg3: memref<1x128xf32, #tpu.memory_space<vmem>>, %arg4: memref<128x128xbf16, #tpu.memory_space<vmem>>) attributes {dimension_semantics = [#tpu.dimension_semantics<parallel>], iteration_bounds = array<i64: 1>, scalar_prefetch = 0 : i64, scratch_operands = 0 : i64, tpu.core_type = #tpu.core_type<tc>, window_params = [{transform_indices = @transform_0, window_bounds = array<i64: 128, 128>}, {pipeline_mode = #tpu.pipeline_mode<synchronous>, transform_indices = @transform_1, window_bounds = array<i64: 1, 128>}, {pipeline_mode = #tpu.pipeline_mode<synchronous>, transform_indices = @transform_2, window_bounds = array<i64: 1, 128>}, {transform_indices = @transform_3, window_bounds = array<i64: 128, 128>}]} {
    %c0 = arith.constant 0 : index
    %c0_0 = arith.constant 0 : index
    %0 = vector.load %arg1[%c0, %c0_0] : memref<128x128xf32, #tpu.memory_space<vmem>>, vector<128x128xf32>
    %c0_1 = arith.constant 0 : index
    %c0_2 = arith.constant 0 : index
    %1 = vector.load %arg2[%c0_1, %c0_2] : memref<1x128xf32, #tpu.memory_space<vmem>>, vector<1x128xf32>
    %2 = vector.broadcast %1 : vector<1x128xf32> to vector<128x128xf32>
    %3 = arith.mulf %0, %2 : vector<128x128xf32>
    %c0_3 = arith.constant 0 : index
    %c0_4 = arith.constant 0 : index
    %4 = vector.load %arg3[%c0_3, %c0_4] : memref<1x128xf32, #tpu.memory_space<vmem>>, vector<1x128xf32>
    %5 = vector.broadcast %4 : vector<1x128xf32> to vector<128x128xf32>
    %6 = arith.addf %3, %5 : vector<128x128xf32>
    %cst = arith.constant 0.000000e+00 : f32
    %7 = vector.broadcast %cst : f32 to vector<128x128xf32>
    %8 = arith.maximumf %6, %7 : vector<128x128xf32>
    %9 = arith.truncf %8 : vector<128x128xf32> to vector<128x128xbf16>
    %c0_5 = arith.constant 0 : index
    %c0_6 = arith.constant 0 : index
    %10 = vector.load %arg4[%c0_5, %c0_6] : memref<128x128xbf16, #tpu.memory_space<vmem>>, vector<128x128xbf16>
    tpu.vector_store %arg4[%c0_5, %c0_6], %9 {strides = array<i32>} : memref<128x128xbf16, #tpu.memory_space<vmem>>, vector<128x128xbf16>,
    return
  }
  func.func @transform_0(%arg0: i32) -> (i32, i32) {
    %c0_i32 = arith.constant 0 : i32
    %c0_i32_0 = arith.constant 0 : i32
    return %arg0, %c0_i32 : i32, i32
  }
  func.func @transform_1(%arg0: i32) -> (i32, i32) {
    %c0_i32 = arith.constant 0 : i32
    %c0_i32_0 = arith.constant 0 : i32
    %c0_i32_1 = arith.constant 0 : i32
    return %c0_i32, %c0_i32_0 : i32, i32
  }
  func.func @transform_2(%arg0: i32) -> (i32, i32) {
    %c0_i32 = arith.constant 0 : i32
    %c0_i32_0 = arith.constant 0 : i32
    %c0_i32_1 = arith.constant 0 : i32
    return %c0_i32, %c0_i32_0 : i32, i32
  }
  func.func @transform_3(%arg0: i32) -> (i32, i32) {
    %c0_i32 = arith.constant 0 : i32
    %c0_i32_0 = arith.constant 0 : i32
    return %arg0, %c0_i32 : i32, i32
  }
}

module attributes {stable_mosaic.version = 11 : i64} {
  func.func @_convt_bias_sigmoid_kernel(%arg0: i32, %arg1: memref<256x64xbf16, #tpu.memory_space<vmem>>, %arg2: memref<64x8xbf16, #tpu.memory_space<vmem>>, %arg3: memref<1x128xf32, #tpu.memory_space<vmem>>, %arg4: memref<16x128xf32, #tpu.memory_space<vmem>>) attributes {dimension_semantics = [#tpu.dimension_semantics<parallel>], iteration_bounds = array<i64: 6>, scalar_prefetch = 0 : i64, scratch_operands = 0 : i64, tpu.core_type = #tpu.core_type<tc>, window_params = [{transform_indices = @transform_0, window_bounds = array<i64: 256, 64>}, {pipeline_mode = #tpu.pipeline_mode<synchronous>, transform_indices = @transform_1, window_bounds = array<i64: 64, 8>}, {pipeline_mode = #tpu.pipeline_mode<synchronous>, transform_indices = @transform_2, window_bounds = array<i64: 1, 128>}, {transform_indices = @transform_3, window_bounds = array<i64: 16, 128>}]} {
    %c0 = arith.constant 0 : index
    %c0_0 = arith.constant 0 : index
    %0 = vector.load %arg1[%c0, %c0_0] : memref<256x64xbf16, #tpu.memory_space<vmem>>, vector<256x64xbf16>
    %c0_1 = arith.constant 0 : index
    %c0_2 = arith.constant 0 : index
    %1 = vector.load %arg2[%c0_1, %c0_2] : memref<64x8xbf16, #tpu.memory_space<vmem>>, vector<64x8xbf16>
    %cst = arith.constant dense<0.000000e+00> : vector<256x8xf32>
    %2 = tpu.matmul %0, %1, %cst {dimension_numbers = #tpu.dot_dimension_numbers<[1], [0], [0], [1], [0, 0, 1, 1], [], []>} : vector<256x64xbf16>, vector<64x8xbf16>, vector<256x8xf32> -> vector<256x8xf32>
    %3 = vector.extract_strided_slice %2 {offsets = [0, 0], sizes = [16, 8], strides = [1, 1]} : vector<256x8xf32> to vector<16x8xf32>
    %4 = vector.extract_strided_slice %2 {offsets = [16, 0], sizes = [16, 8], strides = [1, 1]} : vector<256x8xf32> to vector<16x8xf32>
    %5 = vector.extract_strided_slice %2 {offsets = [32, 0], sizes = [16, 8], strides = [1, 1]} : vector<256x8xf32> to vector<16x8xf32>
    %6 = vector.extract_strided_slice %2 {offsets = [48, 0], sizes = [16, 8], strides = [1, 1]} : vector<256x8xf32> to vector<16x8xf32>
    %7 = vector.extract_strided_slice %2 {offsets = [64, 0], sizes = [16, 8], strides = [1, 1]} : vector<256x8xf32> to vector<16x8xf32>
    %8 = vector.extract_strided_slice %2 {offsets = [80, 0], sizes = [16, 8], strides = [1, 1]} : vector<256x8xf32> to vector<16x8xf32>
    %9 = vector.extract_strided_slice %2 {offsets = [96, 0], sizes = [16, 8], strides = [1, 1]} : vector<256x8xf32> to vector<16x8xf32>
    %10 = vector.extract_strided_slice %2 {offsets = [112, 0], sizes = [16, 8], strides = [1, 1]} : vector<256x8xf32> to vector<16x8xf32>
    %11 = vector.extract_strided_slice %2 {offsets = [128, 0], sizes = [16, 8], strides = [1, 1]} : vector<256x8xf32> to vector<16x8xf32>
    %12 = vector.extract_strided_slice %2 {offsets = [144, 0], sizes = [16, 8], strides = [1, 1]} : vector<256x8xf32> to vector<16x8xf32>
    %13 = vector.extract_strided_slice %2 {offsets = [160, 0], sizes = [16, 8], strides = [1, 1]} : vector<256x8xf32> to vector<16x8xf32>
    %14 = vector.extract_strided_slice %2 {offsets = [176, 0], sizes = [16, 8], strides = [1, 1]} : vector<256x8xf32> to vector<16x8xf32>
    %15 = vector.extract_strided_slice %2 {offsets = [192, 0], sizes = [16, 8], strides = [1, 1]} : vector<256x8xf32> to vector<16x8xf32>
    %16 = vector.extract_strided_slice %2 {offsets = [208, 0], sizes = [16, 8], strides = [1, 1]} : vector<256x8xf32> to vector<16x8xf32>
    %17 = vector.extract_strided_slice %2 {offsets = [224, 0], sizes = [16, 8], strides = [1, 1]} : vector<256x8xf32> to vector<16x8xf32>
    %18 = vector.extract_strided_slice %2 {offsets = [240, 0], sizes = [16, 8], strides = [1, 1]} : vector<256x8xf32> to vector<16x8xf32>
    %19 = tpu.concatenate %3, %4, %5, %6, %7, %8, %9, %10, %11, %12, %13, %14, %15, %16, %17, %18 in 1 : vector<16x8xf32>, vector<16x8xf32>, vector<16x8xf32>, vector<16x8xf32>, vector<16x8xf32>, vector<16x8xf32>, vector<16x8xf32>, vector<16x8xf32>, vector<16x8xf32>, vector<16x8xf32>, vector<16x8xf32>, vector<16x8xf32>, vector<16x8xf32>, vector<16x8xf32>, vector<16x8xf32>, vector<16x8xf32> -> vector<16x128xf32>
    %c0_3 = arith.constant 0 : index
    %c0_4 = arith.constant 0 : index
    %20 = vector.load %arg3[%c0_3, %c0_4] : memref<1x128xf32, #tpu.memory_space<vmem>>, vector<1x128xf32>
    %21 = vector.broadcast %20 : vector<1x128xf32> to vector<16x128xf32>
    %22 = arith.addf %19, %21 : vector<16x128xf32>
    %23 = arith.negf %22 : vector<16x128xf32>
    %24 = math.exp %23 : vector<16x128xf32>
    %cst_5 = arith.constant 1.000000e+00 : f32
    %25 = vector.broadcast %cst_5 : f32 to vector<16x128xf32>
    %26 = arith.addf %25, %24 : vector<16x128xf32>
    %27 = arith.divf %25, %26 : vector<16x128xf32>
    %c0_6 = arith.constant 0 : index
    %c0_7 = arith.constant 0 : index
    %28 = vector.load %arg4[%c0_6, %c0_7] : memref<16x128xf32, #tpu.memory_space<vmem>>, vector<16x128xf32>
    tpu.vector_store %arg4[%c0_6, %c0_7], %27 {strides = array<i32>} : memref<16x128xf32, #tpu.memory_space<vmem>>, vector<16x128xf32>,
    return
  }
  func.func @transform_0(%arg0: i32) -> (i32, i32) {
    %c0_i32 = arith.constant 0 : i32
    %c0_i32_0 = arith.constant 0 : i32
    return %arg0, %c0_i32 : i32, i32
  }
  func.func @transform_1(%arg0: i32) -> (i32, i32) {
    %c0_i32 = arith.constant 0 : i32
    %c0_i32_0 = arith.constant 0 : i32
    %c0_i32_1 = arith.constant 0 : i32
    return %c0_i32, %c0_i32_0 : i32, i32
  }
  func.func @transform_2(%arg0: i32) -> (i32, i32) {
    %c0_i32 = arith.constant 0 : i32
    %c0_i32_0 = arith.constant 0 : i32
    %c0_i32_1 = arith.constant 0 : i32
    return %c0_i32, %c0_i32_0 : i32, i32
  }
  func.func @transform_3(%arg0: i32) -> (i32, i32) {
    %c0_i32 = arith.constant 0 : i32
    %c0_i32_0 = arith.constant 0 : i32
    return %arg0, %c0_i32 : i32, i32
  }
}

</mosaic_0001>

<bundles_post_ra>
// kernel: generator3d_forward.4
= control target key start
LH: loop header
LB: loop body
LE: loop exit
PB: predicated region body
PF: predicated region fallthrough
CT: control target
= control target key end

     0   :  { %8 = vsyncpa [#allocation3], 0  ;;  %s591_s0 = inlined_call_operand.hbm [shape: f32[2,32], index: 0, kind: input, shape index: {}]   ;;  %s592_s1 = inlined_call_operand.hbm [shape: f32[32,1024], index: 1, kind: input, shape index: {}]   ;;  %s593_s2 = inlined_call_operand.hbm [shape: f32[1,1024], index: 2, kind: input, shape index: {}]   ;;  %s594_s3 = inlined_call_operand.vmem [shape: f32[2,1024], index: 3, kind: output, shape index: {}]  }
   0x1   :  { %9 = vsyncpa [#allocation5], 0  ;;  %s541_s12 = smov [#allocation4]  }
   0x2   :  { %s25_s13 = sshll.u32 %s541_s12, 4  ;;  %s26_s13 = int_to_ptr.vmem [resolvable:$true] %s25_s13 }
   0x3   :  { %s485_s14 = scalar_lea.vmem %s26_s13, 4096  ;;  %p490_p1 = scmp.lt.s32.totalorder %s26_s13, %s26_s13 }
   0x4   :  { %p486_p0 = scmp.ne.s32.totalorder %s26_s13, %s485_s14  ;;  %p491_p2 = scmp.lt.s32.totalorder %s485_s14, %s485_s14 }
   0x6   :  { %p492_p3 = por %p491_p2, %p490_p1 }
   0x8   :  { %p493_p4 = pnand %p492_p3, %p486_p0 }
   0xa   :  { %496 = shalt.err (!%p493_p4)
}
   0xb   :  { %s542_s15 = smov 1024   ;;  %s543_s16 = smov 64  }
   0xc   :  { %31 = dma.hbm_to_vmem [thread:$0]  %s592_s1, 4096, %s26_s13, [#allocation5], %s542_s15, %s542_s15, %s543_s16  }
   0xd   :  { %s544_s19 = smov [#allocation2]   ;;  %s545_s21 = smov [#allocation6]  }
   0xe   :  { %s16_s20 = sshll.u32 %s544_s19, 4  ;;  %s38_s22 = sshll.u32 %s545_s21, 4  ;;  %s17_s20 = int_to_ptr.vmem [resolvable:$true] %s16_s20  ;;  %s39_s22 = int_to_ptr.vmem [resolvable:$true] %s38_s22 }
   0xf   :  { %s505_s23 = scalar_lea.vmem %s17_s20, 32  ;;  %p510_p6 = scmp.lt.s32.totalorder %s17_s20, %s17_s20 }
  0x10   :  { %p506_p5 = scmp.ne.s32.totalorder %s17_s20, %s505_s23  ;;  %p511_p7 = scmp.lt.s32.totalorder %s505_s23, %s505_s23 }
  0x12   :  { %p512_p8 = por %p511_p7, %p510_p6 }
  0x14   :  { %p513_p9 = pnand %p512_p8, %p506_p5 }
  0x16   :  { %516 = shalt.err (!%p513_p9)
}
  0x17   :  { %19 = dma.hbm_to_vmem [thread:$0]  %s591_s0, 32, %s17_s20, [#allocation3]  }
  0x18   :  { %s525_s26 = scalar_lea.vmem %s39_s22, 128  ;;  %p530_p11 = scmp.lt.s32.totalorder %s39_s22, %s39_s22 }
  0x19   :  { %p526_p10 = scmp.ne.s32.totalorder %s39_s22, %s525_s26  ;;  %p531_p12 = scmp.lt.s32.totalorder %s525_s26, %s525_s26 }
  0x1b   :  { %p532_p13 = por %p531_p12, %p530_p11 }
  0x1d   :  { %p533_p0 = pnand %p532_p13, %p526_p10 }
  0x1f   :  { %536 = shalt.err (!%p533_p0)
}
  0x20   :  { %41 = dma.hbm_to_vmem [thread:$0]  %s593_s2, 128, %s39_s22, [#allocation5]  }
  0x21   :  { %537 = dma.done.wait [#allocation3], 32  }
  0x22   :  { %538 = vsyncadd [#allocation3], 4294967264 }
  0x23   :  { %539 = dma.done.wait [#allocation5], 4224  }
  0x24   :  { %540 = vsyncadd [#allocation5], 4294963072  ;;  %v546_v0 = vmov 0.0   ;;  %v77_v1 = vld [vmem:[#allocation4 + $0xc8] sm:$0xff]  ;;  %v79_v2 = vld [vmem:[#allocation4 + $0xd8] sm:$0xff]  ;;  %vm126_vm0 = vcmask 261120   ;;  %v86_v34 = vlaneseq }
  0x25   :  { %194 = vmatprep.mubr.f32.mxu0 %v546_v0  ;;  %265 = vmatprep.mubr.f32.mxu1 %v546_v0  ;;  %v76_v3 = vld [vmem:[#allocation4 + $0xc0] sm:$0xff]  ;;  %v78_v4 = vld [vmem:[#allocation4 + $0xd0] sm:$0xff]  ;;  %v69_v5 = vld [vmem:[#allocation4 + $0x88] sm:$0xff]  ;;  %v547_v40 = vmov 1983009808  }
  0x26   :  { %154 = vmatprep.subr.mxu0 %v77_v1  ;;  %225 = vmatprep.subr.mxu1 %v79_v2  ;;  %v71_v6 = vld [vmem:[#allocation4 + $0x98] sm:$0xff]  ;;  %v68_v7 = vld [vmem:[#allocation4 + $0x80] sm:$0xff]  ;;  %v70_v8 = vld [vmem:[#allocation4 + $0x90] sm:$0xff]  ;;  %v87_v35 = vshrl.u32 %v86_v34, 7  ;;  %v425_v41 = vunpack.c.l.s4 %v547_v40 }
  0x27   :  { %155 = vmatpush1.msra.mxu0 %v76_v3  ;;  %226 = vmatpush1.msra.mxu1 %v78_v4  ;;  %v61_v9 = vld [vmem:[#allocation4 + $0x48] sm:$0xff]  ;;  %v63_v10 = vld [vmem:[#allocation4 + $0x58] sm:$0xff]  ;;  %v60_v11 = vld [vmem:[#allocation4 + $0x40] sm:$0xff] }
  0x28   :  { %156 = vmatprep.subr.mxu0 %v69_v5  ;;  %227 = vmatprep.subr.mxu1 %v71_v6  ;;  %v62_v12 = vld [vmem:[#allocation4 + $0x50] sm:$0xff]  ;;  %v53_v13 = vld [vmem:[#allocation4 + $0x8] sm:$0xff]  ;;  %v55_v14 = vld [vmem:[#allocation4 + $0x18] sm:$0xff]  ;;  %v88_v36 = vsub.s32 0, %v87_v35  ;;  %v96_v37 = vsub.s32 2, %v87_v35  ;;  %v92_v39 = vsub.s32 1, %v87_v35  ;;  %v426_v46 = vunpack.c.0.s8 %v425_v41 }
  0x29   :  { %157 = vmatpush1.msra.mxu0 %v68_v7  ;;  %228 = vmatpush1.msra.mxu1 %v70_v8  ;;  %v52_v15 = vld [vmem:[#allocation4] sm:$0xff]  ;;  %v54_v16 = vld [vmem:[#allocation4 + $0x10] sm:$0xff]  ;;  %v51_v17 = vld [vmem:[#allocation2] sm:$0x3]  ;;  %v100_v42 = vsub.s32 3, %v87_v35  ;;  %v104_v57 = vsub.s32 4, %v87_v35 }
  0x2a   :  { %158 = vmatprep.subr.mxu0 %v61_v9  ;;  %229 = vmatprep.subr.mxu1 %v63_v10  ;;  %v81_v18 = vld [vmem:[#allocation4 + $0xe8] sm:$0xff]  ;;  %v83_v19 = vld [vmem:[#allocation4 + $0xf8] sm:$0xff]  ;;  %v80_v20 = vld [vmem:[#allocation4 + $0xe0] sm:$0xff]  ;;  %v429_v55 = vsub.s32 %v426_v46, %v87_v35  ;;  %v112_v58 = vsub.s32 6, %v87_v35  ;;  %v108_v61 = vsub.s32 5, %v87_v35  ;;  %v116_v62 = vsub.s32 7, %v87_v35 }
  0x2b   :  { %159 = vmatpush1.msra.mxu0 %v60_v11  ;;  %230 = vmatpush1.msra.mxu1 %v62_v12  ;;  %v82_v21 = vld [vmem:[#allocation4 + $0xf0] sm:$0xff]  ;;  %v73_v22 = vld [vmem:[#allocation4 + $0xa8] sm:$0xff]  ;;  %v75_v23 = vld [vmem:[#allocation4 + $0xb8] sm:$0xff] }
  0x2c   :  { %160 = vmatprep.subr.mxu0 %v53_v13  ;;  %231 = vmatprep.subr.mxu1 %v55_v14  ;;  %v72_v24 = vld [vmem:[#allocation4 + $0xa0] sm:$0xff]  ;;  %v74_v25 = vld [vmem:[#allocation4 + $0xb0] sm:$0xff]  ;;  %v65_v26 = vld [vmem:[#allocation4 + $0x68] sm:$0xff] }
  0x2d   :  { %161 = vmatpush1.msra.mxu0 %v52_v15  ;;  %232 = vmatpush1.msra.mxu1 %v54_v16  ;;  %v67_v27 = vld [vmem:[#allocation4 + $0x78] sm:$0xff]  ;;  %v64_v28 = vld [vmem:[#allocation4 + $0x60] sm:$0xff]  ;;  %v66_v29 = vld [vmem:[#allocation4 + $0x70] sm:$0xff] }
  0x2e   :  { %466 = vmatmul.mubr.msk.f32.vlgmr.msra.gmra.mxu0 %vm126_vm0, %v51_v17  ;;  %467 = vmatmul.mubr.msk.f32.vlgmr.msra.gmra.mxu1 %vm126_vm0, %v51_v17  ;;  %v57_v30 = vld [vmem:[#allocation4 + $0x28] sm:$0xff]  ;;  %v59_v31 = vld [vmem:[#allocation4 + $0x38] sm:$0xff]  ;;  %v56_v32 = vld [vmem:[#allocation4 + $0x20] sm:$0xff] }
  0x2f   :  { %296 = vmatprep.subr.mxu0 %v81_v18  ;;  %367 = vmatprep.subr.mxu1 %v83_v19  ;;  %v58_v33 = vld [vmem:[#allocation4 + $0x30] sm:$0xff]  ;;  %v84_v38 = vld [vmem:[#allocation6] sm:$0xff] }
  0x30   :  { %297 = vmatpush1.msra.mxu0 %v80_v20  ;;  %368 = vmatpush1.msra.mxu1 %v82_v21  ;;  %v89_v43 = vrot.slane %v84_v38, %v88_v36  ;;  %v97_v44 = vrot.slane %v84_v38, %v96_v37  ;;  %v93_v45 = vrot.slane %v84_v38, %v92_v39 }
  0x31   :  { %298 = vmatprep.subr.mxu0 %v73_v22  ;;  %369 = vmatprep.subr.mxu1 %v75_v23  ;;  %v101_v47 = vrot.slane %v84_v38, %v100_v42  ;;  %v105_v1 = vrot.slane %v84_v38, %v104_v57  ;;  %v113_v3 = vrot.slane %v84_v38, %v112_v58 }
  0x32   :  { %299 = vmatpush1.msra.mxu0 %v72_v24  ;;  %370 = vmatpush1.msra.mxu1 %v74_v25  ;;  %v109_v4 = vrot.slane %v84_v38, %v108_v61  ;;  %v117_v5 = vrot.slane %v84_v38, %v116_v62 }
  0x33   :  { %300 = vmatprep.subr.mxu0 %v65_v26  ;;  %371 = vmatprep.subr.mxu1 %v67_v27 }
  0x34   :  { %301 = vmatpush1.msra.mxu0 %v64_v28  ;;  %372 = vmatpush1.msra.mxu1 %v66_v29 }
  0x35   :  { %302 = vmatprep.subr.mxu0 %v57_v30  ;;  %373 = vmatprep.subr.mxu1 %v59_v31 }
  0x36   :  { %303 = vmatpush1.msra.mxu0 %v56_v32  ;;  %336 = vmatprep.mubr.f32.mxu0 %v546_v0 }
  0x37   :  { %374 = vmatpush1.msra.mxu1 %v58_v33  ;;  %407 = vmatprep.mubr.f32.mxu1 %v546_v0 }
  0x38   :  { %468 = vmatmul.mubr.msk.f32.vlgmr.msra.gmra.mxu0 %vm126_vm0, %v51_v17  ;;  %469 = vmatmul.mubr.msk.f32.vlgmr.msra.gmra.mxu1 %vm126_vm0, %v51_v17 }
  0xee   :  { %v196_v48 = vpop.f32.mrf.mxu0  ;;  %v267_v49 = vpop.f32.mrf.mxu1 }
  0xef   :  { %v197_v50 = vadd.f32 %v196_v48, %v89_v43  ;;  %v268_v51 = vadd.f32 %v267_v49, %v97_v44 }
  0xf0   :  { %v198_v52 = vpop.f32.mrf.mxu0  ;;  %v269_v53 = vpop.f32.mrf.mxu1 }
  0xf1   :  { %v199_v54 = vadd.f32 %v198_v52, %v93_v45  ;;  %v270_v56 = vadd.f32 %v269_v53, %v101_v47 }
  0xf3   :  { %v422_v59 = vcombine.low %v197_v50, %v199_v54  ;;  %v423_v60 = vcombine.low %v268_v51, %v270_v56 }
  0xf5   :  { %v430_v63 = vrot.slane %v422_v59, %v429_v55  ;;  %v437_v0 = vrot.slane %v423_v60, %v429_v55 }
  0xf7   :  { %v438_v2 = vcombine.low %v430_v63, %v437_v0 }
  0xf8   :  { %v338_v6 = vpop.f32.mrf.mxu0  ;;  %v409_v7 = vpop.f32.mrf.mxu1 }
  0xf9   :  { %458 = vst [vmem:[%s594_s3] sm:$0xff] %v438_v2  ;;  %v339_v10 = vadd.f32 %v338_v6, %v105_v1  ;;  %v410_v11 = vadd.f32 %v409_v7, %v113_v3 }
  0xfa   :  { %v340_v8 = vpop.f32.mrf.mxu0  ;;  %v411_v9 = vpop.f32.mrf.mxu1 }
  0xfb   :  { %v341_v12 = vadd.f32 %v340_v8, %v109_v4  ;;  %v412_v13 = vadd.f32 %v411_v9, %v117_v5 }
  0xfd   :  { %v439_v14 = vcombine.low %v339_v10, %v341_v12  ;;  %v440_v15 = vcombine.low %v410_v11, %v412_v13 }
  0xff   :  { %v447_v16 = vrot.slane %v439_v14, %v429_v55  ;;  %v454_v17 = vrot.slane %v440_v15, %v429_v55 }
 0x101   :  { %v455_v18 = vcombine.low %v447_v16, %v454_v17 }
 0x103   :  { %459 = vst [vmem:[%s594_s3 + $0x8] sm:$0xff] %v455_v18 }
 0x104   :  { %464 = vsyncpa [#allocation3], 1 }
 0x105   :  { %465 = vsyncpa [#allocation5], 1 }

// kernel: tile.30
= control target key start
LH: loop header
LB: loop body
LE: loop exit
PB: predicated region body
PF: predicated region fallthrough
CT: control target
= control target key end

     0   :  { %s22_s0 = inlined_call_operand.vmem [shape: f32[8], index: 0, kind: input, shape index: {}]   ;;  %s23_s1 = inlined_call_operand.vmem [shape: f32[8,8], index: 1, kind: output, shape index: {}]  }
   0x1   :  { %v4_v0 = vld [vmem:[%s22_s0] ss:$0 sm:$0xff] }
   0x2   :  { %5 = vst [vmem:[%s23_s1] sm:$0xff] %v4_v0 }

// kernel: tile.33
= control target key start
LH: loop header
LB: loop body
LE: loop exit
PB: predicated region body
PF: predicated region fallthrough
CT: control target
= control target key end

     0   :  { %s69_s10 = smov 56   ;;  %s70_s11 = smov 40   ;;  %vm3_vm0 = vcmask 64512   ;;  %vm9_vm1 = vcmask 523712   ;;  %vm15_vm2 = vcmask 458112   ;;  %vm21_vm3 = vcmask 392512   ;;  %s113_s0 = inlined_call_operand.vmem [shape: f32[8,8], index: 0, kind: input, shape index: {}]   ;;  %s114_s1 = inlined_call_operand.vmem [shape: f32[64], index: 1, kind: output, shape index: {}]  }
   0x1   :  { %v55_v0 = vld [vmem:[%s113_s0 + $0x7] sm:$0x1]   ;;  %v57_v1 = vld [vmem:[%s113_s0 + $0x5] sm:$0x1]   ;;  %v56_v2 = vld [vmem:[%s113_s0 + $0x6] sm:$0x1]  }
   0x2   :  { %7 = vrot.lane.b32.xlu0 %v55_v0, %s69_s10  ;;  %19 = vrot.lane.b32.xlu1 %v57_v1, %s70_s11  ;;  %v58_v3 = vld [vmem:[%s113_s0 + $0x4] sm:$0x1]   ;;  %v2_v4 = vld [vmem:[%s113_s0] sm:$0x1]   ;;  %s71_s18 = smov 48   ;;  %s72_s19 = smov 32  }
   0x3   :  { %4 = vst.msk [vmem:[#allocation0] sm:$0x1] %vm3_vm0, %v2_v4   ;;  %v59_v5 = vld [vmem:[%s113_s0 + $0x3] sm:$0x1]   ;;  %v60_v6 = vld [vmem:[%s113_s0 + $0x2] sm:$0x1]  }
   0x4   :  { %s73_s24 = smov 24   ;;  %s74_s25 = smov 16   ;;  %v61_v7 = vld [vmem:[%s113_s0 + $0x1] sm:$0x1]   ;;  %vm27_vm4 = vcmask 326912   ;;  %vm33_vm5 = vcmask 261312  }
   0x5   :  { %s75_s0 = smov 8   ;;  %vm39_vm6 = vcmask 195712   ;;  %vm45_vm7 = vcmask 130112  }
   0x6   :  { %13 = vrot.lane.b32.xlu0 %v56_v2, %s71_s18  ;;  %25 = vrot.lane.b32.xlu1 %v58_v3, %s72_s19 }
   0xa   :  { %31 = vrot.lane.b32.xlu0 %v59_v5, %s73_s24  ;;  %37 = vrot.lane.b32.xlu1 %v60_v6, %s74_s25 }
   0xe   :  { %43 = vrot.lane.b32.xlu0 %v61_v7, %s75_s0 }
  0x74   :  { %v8_v8 = vpop.permute.xlu0 %7   ;;  %v20_v9 = vpop.permute.xlu1 %19  }
  0x75   :  { %10 = vst.msk [vmem:[#allocation0] sm:$0x1] %vm9_vm1, %v8_v8  }
  0x78   :  { %v14_v10 = vpop.permute.xlu0 %13   ;;  %v26_v11 = vpop.permute.xlu1 %25  }
  0x79   :  { %16 = vst.msk [vmem:[#allocation0] sm:$0x1] %vm15_vm2, %v14_v10  }
  0x7a   :  { %22 = vst.msk [vmem:[#allocation0] sm:$0x1] %vm21_vm3, %v20_v9  }
  0x7b   :  { %28 = vst.msk [vmem:[#allocation0] sm:$0x1] %vm27_vm4, %v26_v11  }
  0x7c   :  { %v32_v12 = vpop.permute.xlu0 %31   ;;  %v38_v13 = vpop.permute.xlu1 %37  }
  0x7d   :  { %34 = vst.msk [vmem:[#allocation0] sm:$0x1] %vm33_vm5, %v32_v12  }
  0x7e   :  { %40 = vst.msk [vmem:[#allocation0] sm:$0x1] %vm39_vm6, %v38_v13  }
  0x80   :  { %v44_v14 = vpop.permute.xlu0 %43  }
  0x81   :  { %46 = vst.msk [vmem:[#allocation0] sm:$0x1] %vm45_vm7, %v44_v14  }
  0x88   :  { %v51_v15 = vld [vmem:[#allocation0] sm:$0x1] }
  0x89   :  { %54 = vst [vmem:[%s114_s1] sm:$0x1] %v51_v15 }

// kernel: tile.34
= control target key start
LH: loop header
LB: loop body
LE: loop exit
PB: predicated region body
PF: predicated region fallthrough
CT: control target
= control target key end

     0   :  { %s22_s0 = inlined_call_operand.vmem [shape: f32[64], index: 0, kind: input, shape index: {}]   ;;  %s23_s1 = inlined_call_operand.vmem [shape: f32[2,64], index: 1, kind: output, shape index: {}]  }
   0x1   :  { %v4_v0 = vld [vmem:[%s22_s0] ss:$0 sm:$0xff] }
   0x2   :  { %5 = vst [vmem:[%s23_s1] sm:$0x3] %v4_v0 }

// kernel: tile.35
= control target key start
LH: loop header
LB: loop body
LE: loop exit
PB: predicated region body
PF: predicated region fallthrough
CT: control target
= control target key end

     0   :  { %vm8_vm0 = vcmask 523264   ;;  %vm14_vm1 = vcmask 1048064   ;;  %s42_s0 = inlined_call_operand.vmem [shape: f32[2,64], index: 0, kind: input, shape index: {}]   ;;  %s43_s1 = inlined_call_operand.vmem [shape: f32[1,128], index: 1, kind: output, shape index: {}]  }
   0x1   :  { %v5_v0 = vld [vmem:[%s42_s0] sm:$0x3]  ;;  %s25_s0 = smov 64  }
   0x2   :  { %6 = vst [vmem:[#allocation1] sm:$0x3] %v5_v0 }
   0x9   :  { %v11_v1 = vld [vmem:[#allocation1 + $0x1] sm:$0x1]   ;;  %v7_v2 = vld [vmem:[#allocation1] sm:$0x1]  }
   0xa   :  { %12 = vrot.lane.b32.xlu0 %v11_v1, %s25_s0  ;;  %9 = vst.msk [vmem:[#allocation0] sm:$0x1] %vm8_vm0, %v7_v2  }
  0x7c   :  { %v13_v3 = vpop.permute.xlu0 %12  }
  0x7d   :  { %15 = vst.msk [vmem:[#allocation0] sm:$0x1] %vm14_vm1, %v13_v3  }
  0x84   :  { %v20_v4 = vld [vmem:[#allocation0] sm:$0x1] }
  0x85   :  { %23 = vst [vmem:[%s43_s1] sm:$0x1] %v20_v4 }

// kernel: generator3d_forward.5
= control target key start
LH: loop header
LB: loop body
LE: loop exit
PB: predicated region body
PF: predicated region fallthrough
CT: control target
= control target key end

     0   :  { %vm406_vm0 = vcmask 64512   ;;  %vm824_vm6 = vcmask 523264   ;;  %s1954_s1 = inlined_call_operand.vmem [shape: bf16[128,64], index: 1, kind: input, shape index: {}]   ;;  %s1955_s3 = inlined_call_operand.vmem [shape: f32[8,64], index: 3, kind: input, shape index: {}]   ;;  %s1956_s2 = inlined_call_operand.vmem [shape: f32[256,8], index: 2, kind: input, shape index: {}]   ;;  %s1957_s0 = inlined_call_operand.vmem [shape: bf16[256,128], index: 0, kind: input, shape index: {}]   ;;  %s1958_s5 = inlined_call_operand.vmem [shape: f32[8,64], index: 5, kind: output, shape index: {1}]   ;;  %s1959_s4 = inlined_call_operand.vmem [shape: f32[128,128], index: 4, kind: output, shape index: {0}]  }
   0x1   :  { %v1317_v0 = vld [vmem:[%s1954_s1 + $0x38] sm:$0xff]   ;;  %v1318_v1 = vld [vmem:[%s1954_s1 + $0x30] sm:$0xff]   ;;  %v1319_v2 = vld [vmem:[%s1954_s1 + $0x28] sm:$0xff]  }
   0x2   :  { %1217 = vmatprep.subr.bf16.mxu0 %v1317_v0  ;;  %v405_v3 = vld [vmem:[%s1955_s3] sm:$0xff]  ;;  %v374_v6 = vld [vmem:[%s1956_s2 + $0x8] sm:$0xff]  ;;  %v375_v7 = vld [vmem:[%s1956_s2 + $0x10] sm:$0xff] }
   0x3   :  { %1218 = vmatpush3.bf16.msra.mxu0 %v1317_v0  ;;  %v373_v4 = vld [vmem:[%s1956_s2] sm:$0xff]  ;;  %1265 = vmatprep.subr.mxu1 %v405_v3  ;;  %v376_v9 = vld [vmem:[%s1956_s2 + $0x18] sm:$0xff]  ;;  %v1322_v12 = vld [vmem:[%s1954_s1 + $0x10] sm:$0xff]  }
   0x4   :  { %1219 = vmatprep.subr.bf16.mxu0 %v1318_v1  ;;  %v1320_v5 = vld [vmem:[%s1954_s1 + $0x20] sm:$0xff]   ;;  %1266 = vmatpush3.msra.mxu1 %v405_v3  ;;  %v1321_v10 = vld [vmem:[%s1954_s1 + $0x18] sm:$0xff]   ;;  %v378_v13 = vld [vmem:[%s1956_s2 + $0x28] sm:$0xff] }
   0x5   :  { %1267 = vmatprep.mubr.msk.f32.mxu1 %vm406_vm0, %v373_v4  ;;  %v1325_v8 = vld [vmem:[%s1957_s0] sm:$0xff]   ;;  %v379_v14 = vld [vmem:[%s1956_s2 + $0x30] sm:$0xff]  ;;  %v380_v15 = vld [vmem:[%s1956_s2 + $0x38] sm:$0xff] }
   0x6   :  { %1268 = vmatmul.mubr.msk.f32.vlgmr.msra.gmra.mxu1 %vm406_vm0, %v374_v6  ;;  %1233 = vmatprep.mubr.bf16.mxu0 %v1325_v8  ;;  %v377_v11 = vld [vmem:[%s1956_s2 + $0x20] sm:$0xff]  ;;  %v1323_v16 = vld [vmem:[%s1954_s1 + $0x8] sm:$0xff]   ;;  %v383_v20 = vld [vmem:[%s1956_s2 + $0x50] sm:$0xff] }
   0x7   :  { %1220 = vmatpush3.bf16.msra.mxu0 %v1318_v1  ;;  %1270 = vmatprep.mubr.msk.f32.mxu1 %vm406_vm0, %v375_v7  ;;  %v381_v17 = vld [vmem:[%s1956_s2 + $0x40] sm:$0xff]  ;;  %v382_v19 = vld [vmem:[%s1956_s2 + $0x48] sm:$0xff]  ;;  %v384_v21 = vld [vmem:[%s1956_s2 + $0x58] sm:$0xff] }
   0x8   :  { %1221 = vmatprep.subr.bf16.mxu0 %v1319_v2  ;;  %v1324_v18 = vld [vmem:[%s1954_s1] sm:$0xff]   ;;  %v1326_v23 = vld [vmem:[%s1957_s0 + $0x8] sm:$0xff]   ;;  %v1327_v24 = vld [vmem:[%s1957_s0 + $0x10] sm:$0xff]  }
   0x9   :  { %v385_v22 = vld [vmem:[%s1956_s2 + $0x60] sm:$0xff]  ;;  %v386_v25 = vld [vmem:[%s1956_s2 + $0x68] sm:$0xff]  ;;  %v387_v26 = vld [vmem:[%s1956_s2 + $0x70] sm:$0xff] }
   0xa   :  { %1271 = vmatmul.mubr.msk.f32.gmra.mxu1 %vm406_vm0, %v376_v9  ;;  %v388_v27 = vld [vmem:[%s1956_s2 + $0x78] sm:$0xff]  ;;  %v389_v28 = vld [vmem:[%s1956_s2 + $0x80] sm:$0xff]  ;;  %v390_v31 = vld [vmem:[%s1956_s2 + $0x88] sm:$0xff] }
   0xb   :  { %1222 = vmatpush3.bf16.msra.mxu0 %v1319_v2  ;;  %1273 = vmatprep.mubr.msk.f32.mxu1 %vm406_vm0, %v377_v11  ;;  %v1328_v29 = vld [vmem:[%s1957_s0 + $0x18] sm:$0xff]   ;;  %v1329_v30 = vld [vmem:[%s1957_s0 + $0x20] sm:$0xff]   ;;  %v391_v32 = vld [vmem:[%s1956_s2 + $0x90] sm:$0xff] }
   0xc   :  { %1223 = vmatprep.subr.bf16.mxu0 %v1320_v5  ;;  %v392_v33 = vld [vmem:[%s1956_s2 + $0x98] sm:$0xff]  ;;  %v393_v34 = vld [vmem:[%s1956_s2 + $0xa0] sm:$0xff]  ;;  %v1330_v35 = vld [vmem:[%s1957_s0 + $0x28] sm:$0xff]  }
   0xd   :  { %v1331_v36 = vld [vmem:[%s1957_s0 + $0x30] sm:$0xff]   ;;  %v394_v37 = vld [vmem:[%s1956_s2 + $0xa8] sm:$0xff]  ;;  %v396_v39 = vld [vmem:[%s1956_s2 + $0xb8] sm:$0xff] }
   0xe   :  { %1274 = vmatmul.mubr.msk.f32.gmra.mxu1 %vm406_vm0, %v378_v13  ;;  %v395_v38 = vld [vmem:[%s1956_s2 + $0xb0] sm:$0xff]  ;;  %v397_v40 = vld [vmem:[%s1956_s2 + $0xc0] sm:$0xff]  ;;  %v1332_v41 = vld [vmem:[%s1957_s0 + $0x38] sm:$0xff]  }
   0xf   :  { %1224 = vmatpush3.bf16.msra.mxu0 %v1320_v5  ;;  %1276 = vmatprep.mubr.msk.f32.mxu1 %vm406_vm0, %v379_v14  ;;  %v1333_v42 = vld [vmem:[%s1957_s0 + $0x40] sm:$0xff]   ;;  %v398_v43 = vld [vmem:[%s1956_s2 + $0xc8] sm:$0xff]  ;;  %v399_v44 = vld [vmem:[%s1956_s2 + $0xd0] sm:$0xff]  ;;  %v1341_v5 = vmov 0.0  }
  0x10   :  { %1225 = vmatprep.subr.bf16.mxu0 %v1321_v10  ;;  %v400_v45 = vld [vmem:[%s1956_s2 + $0xd8] sm:$0xff]  ;;  %v401_v46 = vld [vmem:[%s1956_s2 + $0xe0] sm:$0xff]  ;;  %v1334_v47 = vld [vmem:[%s1957_s0 + $0x48] sm:$0xff]  }
  0x11   :  { %v1335_v48 = vld [vmem:[%s1957_s0 + $0x50] sm:$0xff]   ;;  %v402_v49 = vld [vmem:[%s1956_s2 + $0xe8] sm:$0xff]  ;;  %v404_v51 = vld [vmem:[%s1956_s2 + $0xf8] sm:$0xff] }
  0x12   :  { %1277 = vmatmul.mubr.msk.f32.gmra.mxu1 %vm406_vm0, %v380_v15  ;;  %v403_v50 = vld [vmem:[%s1956_s2 + $0xf0] sm:$0xff]  ;;  %v1336_v52 = vld [vmem:[%s1957_s0 + $0x58] sm:$0xff]   ;;  %v1337_v53 = vld [vmem:[%s1957_s0 + $0x60] sm:$0xff]  }
  0x13   :  { %1226 = vmatpush3.bf16.msra.mxu0 %v1321_v10  ;;  %1279 = vmatprep.mubr.msk.f32.mxu1 %vm406_vm0, %v381_v17  ;;  %v1338_v54 = vld [vmem:[%s1957_s0 + $0x68] sm:$0xff]   ;;  %v1339_v55 = vld [vmem:[%s1957_s0 + $0x70] sm:$0xff]   ;;  %v1340_v56 = vld [vmem:[%s1957_s0 + $0x78] sm:$0xff]   ;;  %s1342_s0 = smov 64  }
  0x14   :  { %1227 = vmatprep.subr.bf16.mxu0 %v1322_v12 }
  0x16   :  { %1280 = vmatmul.mubr.msk.f32.gmra.mxu1 %vm406_vm0, %v382_v19 }
  0x17   :  { %1228 = vmatpush3.bf16.msra.mxu0 %v1322_v12  ;;  %1282 = vmatprep.mubr.msk.f32.mxu1 %vm406_vm0, %v383_v20 }
  0x18   :  { %1229 = vmatprep.subr.bf16.mxu0 %v1323_v16 }
  0x1a   :  { %1283 = vmatmul.mubr.msk.f32.gmra.mxu1 %vm406_vm0, %v384_v21 }
  0x1b   :  { %1230 = vmatpush3.bf16.msra.mxu0 %v1323_v16  ;;  %1285 = vmatprep.mubr.msk.f32.mxu1 %vm406_vm0, %v385_v22 }
  0x1c   :  { %1231 = vmatprep.subr.bf16.mxu0 %v1324_v18 }
  0x1e   :  { %1286 = vmatmul.mubr.msk.f32.gmra.mxu1 %vm406_vm0, %v386_v25 }
  0x1f   :  { %1232 = vmatpush3.bf16.msra.mxu0 %v1324_v18  ;;  %1288 = vmatprep.mubr.msk.f32.mxu1 %vm406_vm0, %v387_v26 }
  0x22   :  { %1234 = vmatmul.mubr.bf16.vlgmr.msra.gmra.mxu0 %v1326_v23  ;;  %1289 = vmatmul.mubr.msk.f32.gmra.mxu1 %vm406_vm0, %v388_v27 }
  0x23   :  { %1237 = vmatprep.mubr.bf16.mxu0 %v1327_v24  ;;  %1291 = vmatprep.mubr.msk.f32.mxu1 %vm406_vm0, %v389_v28 }
  0x26   :  { %1292 = vmatmul.mubr.msk.f32.gmra.mxu1 %vm406_vm0, %v390_v31 }
  0x27   :  { %1294 = vmatprep.mubr.msk.f32.mxu1 %vm406_vm0, %v391_v32 }
  0x2a   :  { %1238 = vmatmul.mubr.bf16.gmra.mxu0 %v1328_v29  ;;  %1295 = vmatmul.mubr.msk.f32.gmra.mxu1 %vm406_vm0, %v392_v33 }
  0x2b   :  { %1241 = vmatprep.mubr.bf16.mxu0 %v1329_v30  ;;  %1297 = vmatprep.mubr.msk.f32.mxu1 %vm406_vm0, %v393_v34 }
  0x2e   :  { %1298 = vmatmul.mubr.msk.f32.gmra.mxu1 %vm406_vm0, %v394_v37 }
  0x2f   :  { %1300 = vmatprep.mubr.msk.f32.mxu1 %vm406_vm0, %v395_v38 }
  0x32   :  { %1242 = vmatmul.mubr.bf16.gmra.mxu0 %v1330_v35  ;;  %1301 = vmatmul.mubr.msk.f32.gmra.mxu1 %vm406_vm0, %v396_v39 }
  0x33   :  { %1245 = vmatprep.mubr.bf16.mxu0 %v1331_v36  ;;  %1303 = vmatprep.mubr.msk.f32.mxu1 %vm406_vm0, %v397_v40 }
  0x36   :  { %1304 = vmatmul.mubr.msk.f32.gmra.mxu1 %vm406_vm0, %v398_v43 }
  0x37   :  { %1306 = vmatprep.mubr.msk.f32.mxu1 %vm406_vm0, %v399_v44 }
  0x3a   :  { %1246 = vmatmul.mubr.bf16.gmra.mxu0 %v1332_v41  ;;  %1307 = vmatmul.mubr.msk.f32.gmra.mxu1 %vm406_vm0, %v400_v45 }
  0x3b   :  { %1249 = vmatprep.mubr.bf16.mxu0 %v1333_v42  ;;  %1309 = vmatprep.mubr.msk.f32.mxu1 %vm406_vm0, %v401_v46 }
  0x3e   :  { %1310 = vmatmul.mubr.msk.f32.gmra.mxu1 %vm406_vm0, %v402_v49 }
  0x3f   :  { %1312 = vmatprep.mubr.msk.f32.mxu1 %vm406_vm0, %v403_v50 }
  0x42   :  { %1250 = vmatmul.mubr.bf16.gmra.mxu0 %v1334_v47  ;;  %1313 = vmatmul.mubr.msk.f32.gmra.mxu1 %vm406_vm0, %v404_v51 }
  0x43   :  { %1253 = vmatprep.mubr.bf16.mxu0 %v1335_v48 }
  0x4a   :  { %1254 = vmatmul.mubr.bf16.gmra.mxu0 %v1336_v52 }
  0x4b   :  { %1257 = vmatprep.mubr.bf16.mxu0 %v1337_v53 }
  0x52   :  { %1258 = vmatmul.mubr.bf16.gmra.mxu0 %v1338_v54 }
  0x53   :  { %1261 = vmatprep.mubr.bf16.mxu0 %v1339_v55 }
  0x5a   :  { %1262 = vmatmul.mubr.bf16.gmra.mxu0 %v1340_v56 }
  0xc6   :  { %v1269_v57 = vpop.f32.mrf.mxu1 }
  0xc7   :  { %vm729_vm3 = vcmp.lt.f32.partialorder %v1269_v57, 0.5 }
  0xc8   :  { %v569_v58 = vpop.f32.mrf.mxu1  ;;  %v761_v13 = vsel %vm729_vm3, 1.0, %v1341_v5 }
  0xc9   :  { %vm728_vm1 = vcmp.lt.f32.partialorder %v569_v58, 0.5 }
  0xca   :  { %v1272_v59 = vpop.f32.mrf.mxu1  ;;  %v760_v6 = vsel %vm728_vm1, 1.0, %v1341_v5 }
  0xcb   :  { %vm731_vm4 = vcmp.lt.f32.partialorder %v1272_v59, 0.5 }
  0xcc   :  { %v579_v60 = vpop.f32.mrf.mxu1  ;;  %v763_v14 = vsel %vm731_vm4, 1.0, %v1341_v5 }
  0xcd   :  { %vm730_vm2 = vcmp.lt.f32.partialorder %v579_v60, 0.5 }
  0xce   :  { %v1275_v61 = vpop.f32.mrf.mxu1  ;;  %v762_v9 = vsel %vm730_vm2, 1.0, %v1341_v5 }
  0xcf   :  { %vm733_vm7 = vcmp.lt.f32.partialorder %v1275_v61, 0.5 }
  0xd0   :  { %v589_v62 = vpop.f32.mrf.mxu1  ;;  %v765_v31 = vsel %vm733_vm7, 1.0, %v1341_v5 }
  0xd1   :  { %vm732_vm5 = vcmp.lt.f32.partialorder %v589_v62, 0.5 }
  0xd2   :  { %v1278_v63 = vpop.f32.mrf.mxu1  ;;  %v764_v23 = vsel %vm732_vm5, 1.0, %v1341_v5 }
  0xd3   :  { %vm735_vm9 = vcmp.lt.f32.partialorder %v1278_v63, 0.5 }
  0xd4   :  { %v599_v0 = vpop.f32.mrf.mxu1  ;;  %v767_v40 = vsel %vm735_vm9, 1.0, %v1341_v5 }
  0xd5   :  { %vm734_vm8 = vcmp.lt.f32.partialorder %v599_v0, 0.5 }
  0xd6   :  { %v1576_v1 = vpop.f32.mrf.mxu1  ;;  %v766_v33 = vsel %vm734_vm8, 1.0, %v1341_v5 }
  0xd7   :  { %vm737_vm11 = vcmp.lt.f32.partialorder %v1576_v1, 0.5 }
  0xd8   :  { %v1578_v2 = vpop.f32.mrf.mxu1 }
  0xd9   :  { %vm736_vm10 = vcmp.lt.f32.partialorder %v1578_v2, 0.5 }
  0xda   :  { %v1580_v3 = vpop.f32.mrf.mxu1  ;;  %v768_v59 = vsel %vm736_vm10, 1.0, %v1341_v5 }
  0xdb   :  { %vm739_vm13 = vcmp.lt.f32.partialorder %v1580_v3, 0.5 }
  0xdc   :  { %v1582_v4 = vpop.f32.mrf.mxu1  ;;  %v771_v1 = vsel %vm739_vm13, 1.0, %v1341_v5 }
  0xdd   :  { %vm738_vm12 = vcmp.lt.f32.partialorder %v1582_v4, 0.5 }
  0xde   :  { %v1587_v8 = vpop.f32.mrf.mxu1 }
  0xdf   :  { %vm741_vm15 = vcmp.lt.f32.partialorder %v1587_v8, 0.5 }
  0xe0   :  { %v1592_v11 = vpop.f32.mrf.mxu1 }
  0xe1   :  { %vm740_vm14 = vcmp.lt.f32.partialorder %v1592_v11, 0.5 }
  0xe2   :  { %v1585_v7 = vpop.f32.mrf.mxu0  ;;  %v1599_v16 = vpop.f32.mrf.mxu1 }
  0xe3   :  { %v794_v17 = vmul.f32 %v1585_v7, %v762_v9  ;;  %v769_v9 = vsel %vm737_vm11, 1.0, %v1341_v5  ;;  %vm743_vm1 = vcmp.lt.f32.partialorder %v1599_v16, 0.5 }
  0xe4   :  { %v1590_v10 = vpop.f32.mrf.mxu0  ;;  %v1604_v19 = vpop.f32.mrf.mxu1  ;;  %v775_v8 = vsel %vm743_vm1, 1.0, %v1341_v5 }
  0xe5   :  { %v792_v12 = vmul.f32 %v760_v6, %v1590_v10  ;;  %v896_v26 = vmul.f32 %v1585_v7, %v794_v17  ;;  %v828_v30 = vsel %vm824_vm6, %v794_v17, 0.0  ;;  %vm742_vm0 = vcmp.lt.f32.partialorder %v1604_v19, 0.5 }
  0xe6   :  { %v1597_v15 = vpop.f32.mrf.mxu0  ;;  %v1612_v25 = vpop.f32.mrf.mxu1 }
  0xe7   :  { %v894_v20 = vmul.f32 %v792_v12, %v1590_v10  ;;  %v795_v21 = vmul.f32 %v1597_v15, %v763_v14  ;;  %v825_v27 = vsel %vm824_vm6, %v792_v12, 0.0  ;;  %v929_v45 = vsel %vm824_vm6, %v896_v26, 0.0 }
  0xe8   :  { %v1602_v18 = vpop.f32.mrf.mxu0  ;;  %v1624_v35 = vpop.f32.mrf.mxu1  ;;  %vm745_vm3 = vcmp.lt.f32.partialorder %v1612_v25, 0.5 }
  0xe9   :  { %v793_v22 = vmul.f32 %v761_v13, %v1602_v18  ;;  %v926_v36 = vsel %vm824_vm6, %v894_v20, 0.0  ;;  %v897_v37 = vmul.f32 %v1597_v15, %v795_v21  ;;  %v830_v46 = vsel %vm824_vm6, %v795_v21, 0.0 }
  0xea   :  { %v1610_v24 = vpop.f32.mrf.mxu0  ;;  %v1635_v44 = vpop.f32.mrf.mxu1  ;;  %v770_v13 = vsel %vm738_vm12, 1.0, %v1341_v5  ;;  %vm744_vm2 = vcmp.lt.f32.partialorder %v1624_v35, 0.5 }
  0xeb   :  { %v826_v28 = vsel %vm824_vm6, %v793_v22, 0.0  ;;  %v895_v29 = vmul.f32 %v793_v22, %v1602_v18  ;;  %v798_v47 = vmul.f32 %v1610_v24, %v766_v33  ;;  %v931_v53 = vsel %vm824_vm6, %v897_v37, 0.0 }
  0xec   :  { %v827_v32 = vadd.f32 %v826_v28, %v825_v27  ;;  %v1622_v34 = vpop.f32.mrf.mxu0  ;;  %v1645_v52 = vpop.f32.mrf.mxu1  ;;  %vm747_vm5 = vcmp.lt.f32.partialorder %v1635_v44, 0.5 }
  0xed   :  { %v927_v38 = vsel %vm824_vm6, %v895_v29, 0.0  ;;  %v796_v39 = vmul.f32 %v764_v23, %v1622_v34  ;;  %v900_v62 = vmul.f32 %v1610_v24, %v798_v47  ;;  %v836_v20 = vsel %vm824_vm6, %v798_v47, 0.0 }
  0xee   :  { %v829_v41 = vadd.f32 %v828_v30, %v827_v32  ;;  %v928_v42 = vadd.f32 %v927_v38, %v926_v36  ;;  %v1633_v43 = vpop.f32.mrf.mxu0  ;;  %v1657_v61 = vpop.f32.mrf.mxu1  ;;  %vm746_vm4 = vcmp.lt.f32.partialorder %v1645_v52, 0.5  ;;  %v779_v25 = vsel %vm747_vm5, 1.0, %v1341_v5 }
  0xef   :  { %v898_v48 = vmul.f32 %v796_v39, %v1622_v34  ;;  %v832_v54 = vsel %vm824_vm6, %v796_v39, 0.0  ;;  %v799_v55 = vmul.f32 %v1633_v43, %v767_v40  ;;  %v937_v29 = vsel %vm824_vm6, %v900_v62, 0.0 }
  0xf0   :  { %v930_v49 = vadd.f32 %v929_v45, %v928_v42  ;;  %v831_v50 = vadd.f32 %v830_v46, %v829_v41  ;;  %v1642_v51 = vpop.f32.mrf.mxu0  ;;  %v1671_v17 = vpop.f32.mrf.mxu1  ;;  %v772_v46 = vsel %vm740_vm14, 1.0, %v1341_v5  ;;  %vm749_vm8 = vcmp.lt.f32.partialorder %v1657_v61, 0.5 }
  0xf1   :  { %v797_v56 = vmul.f32 %v765_v31, %v1642_v51  ;;  %v933_v63 = vsel %vm824_vm6, %v898_v48, 0.0  ;;  %v901_v21 = vmul.f32 %v1633_v43, %v799_v55  ;;  %v838_v30 = vsel %vm824_vm6, %v799_v55, 0.0 }
  0xf2   :  { %v833_v57 = vadd.f32 %v832_v54, %v831_v50  ;;  %v932_v58 = vadd.f32 %v931_v53, %v930_v49  ;;  %v1655_v60 = vpop.f32.mrf.mxu0  ;;  %v1683_v28 = vpop.f32.mrf.mxu1  ;;  %v773_v55 = vsel %vm741_vm15, 1.0, %v1341_v5  ;;  %vm748_vm7 = vcmp.lt.f32.partialorder %v1671_v17, 0.5 }
  0xf3   :  { %v834_v0 = vsel %vm824_vm6, %v797_v56, 0.0  ;;  %v899_v6 = vmul.f32 %v797_v56, %v1642_v51  ;;  %v802_v31 = vmul.f32 %v1655_v60, %v770_v13  ;;  %v939_v38 = vsel %vm824_vm6, %v901_v21, 0.0 }
  0xf4   :  { %v934_v2 = vadd.f32 %v933_v63, %v932_v58  ;;  %v835_v12 = vadd.f32 %v834_v0, %v833_v57  ;;  %v1669_v14 = vpop.f32.mrf.mxu0  ;;  %v1693_v37 = vpop.f32.mrf.mxu1  ;;  %v774_v57 = vsel %vm742_vm0, 1.0, %v1341_v5  ;;  %vm751_vm10 = vcmp.lt.f32.partialorder %v1683_v28, 0.5 }
  0xf5   :  { %v935_v22 = vsel %vm824_vm6, %v899_v6, 0.0  ;;  %v800_v23 = vmul.f32 %v768_v59, %v1669_v14  ;;  %v904_v49 = vmul.f32 %v1655_v60, %v802_v31  ;;  %v844_v59 = vsel %vm824_vm6, %v802_v31, 0.0 }
  0xf6   :  { %v837_v26 = vadd.f32 %v836_v20, %v835_v12  ;;  %v936_v27 = vadd.f32 %v935_v22, %v934_v2  ;;  %v1681_v4 = vpop.f32.mrf.mxu0  ;;  %v1705_v48 = vpop.f32.mrf.mxu1  ;;  %vm750_vm9 = vcmp.lt.f32.partialorder %v1693_v37, 0.5  ;;  %v783_v61 = vsel %vm751_vm10, 1.0, %v1341_v5 }
  0xf7   :  { %v902_v32 = vmul.f32 %v800_v23, %v1669_v14  ;;  %v840_v39 = vsel %vm824_vm6, %v800_v23, 0.0  ;;  %v803_v40 = vmul.f32 %v1681_v4, %v771_v1  ;;  %v945_v12 = vsel %vm824_vm6, %v904_v49, 0.0 }
  0xf8   :  { %v938_v33 = vadd.f32 %v937_v29, %v936_v27  ;;  %v839_v3 = vadd.f32 %v838_v30, %v837_v26  ;;  %v1690_v36 = vpop.f32.mrf.mxu0  ;;  %v1723_v6 = vpop.f32.mrf.mxu1  ;;  %v782_v17 = vsel %vm750_vm9, 1.0, %v1341_v5  ;;  %vm753_vm12 = vcmp.lt.f32.partialorder %v1705_v48, 0.5 }
  0xf9   :  { %v801_v41 = vmul.f32 %v769_v9, %v1690_v36  ;;  %v941_v50 = vsel %vm824_vm6, %v902_v32, 0.0  ;;  %v905_v62 = vmul.f32 %v1681_v4, %v803_v40  ;;  %v846_v13 = vsel %vm824_vm6, %v803_v40, 0.0 }
  0xfa   :  { %v841_v42 = vadd.f32 %v840_v39, %v839_v3  ;;  %v940_v45 = vadd.f32 %v939_v38, %v938_v33  ;;  %v1703_v47 = vpop.f32.mrf.mxu0  ;;  %v1743_v30 = vpop.f32.mrf.mxu1  ;;  %v776_v33 = vsel %vm744_vm2, 1.0, %v1341_v5  ;;  %vm752_vm11 = vcmp.lt.f32.partialorder %v1723_v6, 0.5 }
  0xfb   :  { %v842_v53 = vsel %vm824_vm6, %v801_v41, 0.0  ;;  %v903_v54 = vmul.f32 %v801_v41, %v1690_v36  ;;  %v806_v20 = vmul.f32 %v1703_v47, %v774_v57  ;;  %v947_v1 = vsel %vm824_vm6, %v905_v62, 0.0 }
  0xfc   :  { %v942_v11 = vadd.f32 %v941_v50, %v940_v45  ;;  %v843_v56 = vadd.f32 %v842_v53, %v841_v42  ;;  %v1717_v58 = vpop.f32.mrf.mxu0  ;;  %v777_v42 = vsel %vm745_vm3, 1.0, %v1341_v5  ;;  %vm755_vm14 = vcmp.lt.f32.partialorder %v1743_v30, 0.5 }
  0xfd   :  { %v943_v63 = vsel %vm824_vm6, %v903_v54, 0.0  ;;  %v804_v0 = vmul.f32 %v772_v46, %v1717_v58  ;;  %v908_v38 = vmul.f32 %v1703_v47, %v806_v20  ;;  %v778_v46 = vsel %vm746_vm4, 1.0, %v1341_v5 }
  0xfe   :  { %v845_v9 = vadd.f32 %v844_v59, %v843_v56  ;;  %v944_v2 = vadd.f32 %v943_v63, %v942_v11  ;;  %v1729_v19 = vpop.f32.mrf.mxu0  ;;  %v852_v50 = vsel %vm824_vm6, %v806_v20, 0.0  ;;  %v1764_v11 = vpop.f32.mrf.mxu1  ;;  %v787_v48 = vsel %vm755_vm14, 1.0, %v1341_v5 }
  0xff   :  { %v906_v21 = vmul.f32 %v804_v0, %v1717_v58  ;;  %v848_v26 = vsel %vm824_vm6, %v804_v0, 0.0  ;;  %v807_v27 = vmul.f32 %v1729_v19, %v775_v8  ;;  %v953_v59 = vsel %vm824_vm6, %v908_v38, 0.0 }
 0x100   :  { %v946_v22 = vadd.f32 %v945_v12, %v944_v2  ;;  %v847_v23 = vadd.f32 %v846_v13, %v845_v9  ;;  %v1736_v16 = vpop.f32.mrf.mxu0  ;;  %vm754_vm13 = vcmp.lt.f32.partialorder %v1764_v11, 0.5  ;;  %vm995_vm3 = vcmask 1040384  }
 0x101   :  { %v805_v29 = vmul.f32 %v773_v55, %v1736_v16  ;;  %v949_v39 = vsel %vm824_vm6, %v906_v21, 0.0  ;;  %v909_v53 = vmul.f32 %v1729_v19, %v807_v27  ;;  %v854_v62 = vsel %vm824_vm6, %v807_v27, 0.0  ;;  %v1778_v21 = vpop.f32.mrf.mxu1 }
 0x102   :  { %v849_v31 = vadd.f32 %v848_v26, %v847_v23  ;;  %v948_v32 = vadd.f32 %v947_v1, %v946_v22  ;;  %v1251_v3 = vpop.f32.mrf.mxu0  ;;  %v780_v1 = vsel %vm748_vm7, 1.0, %v1341_v5  ;;  %v786_v6 = vsel %vm754_vm13, 1.0, %v1341_v5 }
 0x103   :  { %v850_v40 = vsel %vm824_vm6, %v805_v29, 0.0  ;;  %v907_v41 = vmul.f32 %v805_v29, %v1736_v16  ;;  %1020 = vrot.lane.b32.xlu1 %v1251_v3, %s1342_s0  ;;  %v810_v63 = vmul.f32 %v1251_v3, %v778_v46  ;;  %v955_v44 = vsel %vm824_vm6, %v909_v53, 0.0 }
 0x104   :  { %v950_v35 = vadd.f32 %v949_v39, %v948_v32  ;;  %v851_v45 = vadd.f32 %v850_v40, %v849_v31  ;;  %v310_v49 = vpop.f32.mrf.mxu0  ;;  %vm757_vm0 = vcmp.lt.f32.partialorder %v1778_v21, 0.5  ;;  %vm997_vm4 = vcmask 1041408  }
 0x105   :  { %v951_v54 = vsel %vm824_vm6, %v907_v41, 0.0  ;;  %v808_v55 = vmul.f32 %v776_v33, %v310_v49  ;;  %1016 = vrot.lane.b32.xlu0 %v310_v49, %s1342_s0  ;;  %v912_v27 = vmul.f32 %v1251_v3, %v810_v63  ;;  %v781_v33 = vsel %vm749_vm8, 1.0, %v1341_v5 }
 0x106   :  { %v853_v56 = vadd.f32 %v852_v50, %v851_v45  ;;  %v952_v57 = vadd.f32 %v951_v54, %v950_v35  ;;  %v1252_v52 = vpop.f32.mrf.mxu0  ;;  %v860_v41 = vsel %vm824_vm6, %v810_v63, 0.0  ;;  %v1795_v45 = vpop.f32.mrf.mxu1 }
 0x107   :  { %v910_v0 = vmul.f32 %v808_v55, %v310_v49  ;;  %1022 = vrot.lane.b32.xlu1 %v1252_v52, %s1342_s0  ;;  %v856_v12 = vsel %vm824_vm6, %v808_v55, 0.0  ;;  %v811_v13 = vmul.f32 %v1252_v52, %v779_v25  ;;  %v961_v50 = vsel %vm824_vm6, %v912_v27, 0.0 }
 0x108   :  { %v954_v8 = vadd.f32 %v953_v59, %v952_v57  ;;  %v855_v9 = vadd.f32 %v854_v62, %v853_v56  ;;  %v313_v2 = vpop.f32.mrf.mxu0  ;;  %v1809_v63 = vpop.f32.mrf.mxu1  ;;  %vm756_vm15 = vcmp.lt.f32.partialorder %v1795_v45, 0.5 }
 0x109   :  { %v809_v20 = vmul.f32 %v777_v42, %v313_v2  ;;  %1018 = vrot.lane.b32.xlu0 %v313_v2, %s1342_s0  ;;  %v957_v29 = vsel %vm824_vm6, %v910_v0, 0.0  ;;  %v913_v42 = vmul.f32 %v1252_v52, %v811_v13  ;;  %v862_v53 = vsel %vm824_vm6, %v811_v13, 0.0 }
 0x10a   :  { %v857_v22 = vadd.f32 %v856_v12, %v855_v9  ;;  %v956_v23 = vadd.f32 %v955_v44, %v954_v8  ;;  %v1255_v26 = vpop.f32.mrf.mxu0  ;;  %v784_v9 = vsel %vm752_vm11, 1.0, %v1341_v5  ;;  %vm759_vm2 = vcmp.lt.f32.partialorder %v1809_v63, 0.5 }
 0x10b   :  { %v858_v31 = vsel %vm824_vm6, %v809_v20, 0.0  ;;  %v911_v32 = vmul.f32 %v809_v20, %v313_v2  ;;  %v814_v54 = vmul.f32 %v1255_v26, %v782_v17  ;;  %v963_v28 = vsel %vm824_vm6, %v913_v42, 0.0 }
 0x10c   :  { %v958_v38 = vadd.f32 %v957_v29, %v956_v23  ;;  %v859_v39 = vadd.f32 %v858_v31, %v857_v22  ;;  %v326_v40 = vpop.f32.mrf.mxu0  ;;  %v785_v22 = vsel %vm753_vm12, 1.0, %v1341_v5 }
 0x10d   :  { %v959_v3 = vsel %vm824_vm6, %v911_v32, 0.0  ;;  %v812_v35 = vmul.f32 %v780_v1, %v326_v40  ;;  %1028 = vrot.lane.b32.xlu0 %v1255_v26, %s1342_s0  ;;  %v916_v44 = vmul.f32 %v1255_v26, %v814_v54  ;;  %v868_v26 = vsel %vm824_vm6, %v814_v54, 0.0 }
 0x10e   :  { %v861_v46 = vadd.f32 %v860_v41, %v859_v39  ;;  %v960_v49 = vadd.f32 %v959_v3, %v958_v38  ;;  %v1256_v37 = vpop.f32.mrf.mxu0  ;;  %v788_v54 = vsel %vm756_vm15, 1.0, %v1341_v5 }
 0x10f   :  { %v914_v55 = vmul.f32 %v812_v35, %v326_v40  ;;  %1030 = vrot.lane.b32.xlu1 %v1256_v37, %s1342_s0  ;;  %v864_v52 = vsel %vm824_vm6, %v812_v35, 0.0  ;;  %v815_v59 = vmul.f32 %v1256_v37, %v783_v61  ;;  %v969_v17 = vsel %vm824_vm6, %v916_v44, 0.0 }
 0x110   :  { %v962_v25 = vadd.f32 %v961_v50, %v960_v49  ;;  %v863_v56 = vadd.f32 %v862_v53, %v861_v46  ;;  %v329_v57 = vpop.f32.mrf.mxu0 }
 0x111   :  { %v813_v62 = vmul.f32 %v781_v33, %v329_v57  ;;  %1024 = vrot.lane.b32.xlu0 %v326_v40, %s1342_s0  ;;  %v965_v12 = vsel %vm824_vm6, %v914_v55, 0.0  ;;  %v917_v29 = vmul.f32 %v1256_v37, %v815_v59  ;;  %v719_v33 = vpop.f32.mrf.mxu1  ;;  %v870_v40 = vsel %vm824_vm6, %v815_v59, 0.0 }
 0x112   :  { %v865_v0 = vadd.f32 %v864_v52, %v863_v56  ;;  %v964_v8 = vadd.f32 %v963_v28, %v962_v25  ;;  %v1259_v2 = vpop.f32.mrf.mxu0  ;;  %vm758_vm1 = vcmp.lt.f32.partialorder %v719_v33, 0.5 }
 0x113   :  { %v866_v13 = vsel %vm824_vm6, %v813_v62, 0.0  ;;  %v915_v20 = vmul.f32 %v813_v62, %v329_v57  ;;  %1026 = vrot.lane.b32.xlu1 %v329_v57, %s1342_s0  ;;  %v818_v41 = vmul.f32 %v1259_v2, %v786_v6  ;;  %v971_v30 = vsel %vm824_vm6, %v917_v29, 0.0 }
 0x114   :  { %v966_v23 = vadd.f32 %v965_v12, %v964_v8  ;;  %v867_v1 = vadd.f32 %v866_v13, %v865_v0  ;;  %v342_v27 = vpop.f32.mrf.mxu0  ;;  %v790_v62 = vsel %vm758_vm1, 1.0, %v1341_v5  ;;  %v791_v12 = vsel %vm759_vm2, 1.0, %v1341_v5 }
 0x115   :  { %v967_v31 = vsel %vm824_vm6, %v915_v20, 0.0  ;;  %v816_v32 = vmul.f32 %v784_v9, %v342_v27  ;;  %1036 = vrot.lane.b32.xlu0 %v1259_v2, %s1342_s0  ;;  %v920_v25 = vmul.f32 %v1259_v2, %v818_v41  ;;  %v876_v45 = vsel %vm824_vm6, %v818_v41, 0.0 }
 0x116   :  { %v869_v38 = vadd.f32 %v868_v26, %v867_v1  ;;  %v968_v39 = vadd.f32 %v967_v31, %v966_v23  ;;  %v1260_v11 = vpop.f32.mrf.mxu0  ;;  %v789_v2 = vsel %vm757_vm0, 1.0, %v1341_v5 }
 0x117   :  { %v918_v42 = vmul.f32 %v816_v32, %v342_v27  ;;  %1038 = vrot.lane.b32.xlu1 %v1260_v11, %s1342_s0  ;;  %v872_v46 = vsel %vm824_vm6, %v816_v32, 0.0  ;;  %v819_v49 = vmul.f32 %v1260_v11, %v787_v48  ;;  %v977_v23 = vsel %vm824_vm6, %v920_v25, 0.0 }
 0x118   :  { %v970_v3 = vadd.f32 %v969_v17, %v968_v39  ;;  %v871_v35 = vadd.f32 %v870_v40, %v869_v38  ;;  %v345_v61 = vpop.f32.mrf.mxu0 }
 0x119   :  { %v817_v37 = vmul.f32 %v785_v22, %v345_v61  ;;  %1032 = vrot.lane.b32.xlu0 %v342_v27, %s1342_s0  ;;  %v973_v56 = vsel %vm824_vm6, %v918_v42, 0.0  ;;  %v921_v8 = vmul.f32 %v1260_v11, %v819_v49  ;;  %v878_v1 = vsel %vm824_vm6, %v819_v49, 0.0 }
 0x11a   :  { %v873_v50 = vadd.f32 %v872_v46, %v871_v35  ;;  %v972_v53 = vadd.f32 %v971_v30, %v970_v3  ;;  %v1263_v55 = vpop.f32.mrf.mxu0 }
 0x11b   :  { %v874_v57 = vsel %vm824_vm6, %v817_v37, 0.0  ;;  %v919_v28 = vmul.f32 %v817_v37, %v345_v61  ;;  %1034 = vrot.lane.b32.xlu1 %v345_v61, %s1342_s0  ;;  %v822_v6 = vmul.f32 %v1263_v55, %v790_v62  ;;  %v979_v32 = vsel %vm824_vm6, %v921_v8, 0.0 }
 0x11c   :  { %v974_v52 = vadd.f32 %v973_v56, %v972_v53  ;;  %v875_v59 = vadd.f32 %v874_v57, %v873_v50  ;;  %v358_v0 = vpop.f32.mrf.mxu0 }
 0x11d   :  { %v975_v9 = vsel %vm824_vm6, %v919_v28, 0.0  ;;  %v820_v44 = vmul.f32 %v788_v54, %v358_v0  ;;  %1040 = vrot.lane.b32.xlu0 %v358_v0, %s1342_s0  ;;  %v924_v38 = vmul.f32 %v1263_v55, %v822_v6  ;;  %v884_v42 = vsel %vm824_vm6, %v822_v6, 0.0 }
 0x11e   :  { %v877_v13 = vadd.f32 %v876_v45, %v875_v59  ;;  %v976_v20 = vadd.f32 %v975_v9, %v974_v52  ;;  %v1264_v22 = vpop.f32.mrf.mxu0 }
 0x11f   :  { %v922_v27 = vmul.f32 %v820_v44, %v358_v0  ;;  %v880_v21 = vsel %vm824_vm6, %v820_v44, 0.0  ;;  %v823_v33 = vmul.f32 %v1264_v22, %v791_v12  ;;  %v985_v46 = vsel %vm824_vm6, %v924_v38, 0.0 }
 0x120   :  { %v978_v26 = vadd.f32 %v977_v23, %v976_v20  ;;  %v879_v29 = vadd.f32 %v878_v1, %v877_v13  ;;  %v361_v31 = vpop.f32.mrf.mxu0 }
 0x121   :  { %v821_v48 = vmul.f32 %v789_v2, %v361_v31  ;;  %1044 = vrot.lane.b32.xlu0 %v1263_v55, %s1342_s0  ;;  %1042 = vrot.lane.b32.xlu1 %v361_v31, %s1342_s0  ;;  %v981_v39 = vsel %vm824_vm6, %v922_v27, 0.0  ;;  %v925_v3 = vmul.f32 %v1264_v22, %v823_v33  ;;  %v886_v49 = vsel %vm824_vm6, %v823_v33, 0.0 }
 0x122   :  { %v881_v5 = vadd.f32 %v880_v21, %v879_v29  ;;  %v980_v63 = vadd.f32 %v979_v32, %v978_v26 }
 0x123   :  { %v882_v11 = vsel %vm824_vm6, %v821_v48, 0.0  ;;  %v923_v17 = vmul.f32 %v821_v48, %v361_v31  ;;  %v987_v53 = vsel %vm824_vm6, %v925_v3, 0.0 }
 0x124   :  { %v982_v40 = vadd.f32 %v981_v39, %v980_v63  ;;  %v883_v41 = vadd.f32 %v882_v11, %v881_v5 }
 0x125   :  { %v983_v35 = vsel %vm824_vm6, %v923_v17, 0.0  ;;  %1046 = vrot.lane.b32.xlu1 %v1264_v22, %s1342_s0 }
 0x126   :  { %v885_v61 = vadd.f32 %v884_v42, %v883_v41  ;;  %v984_v30 = vadd.f32 %v983_v35, %v982_v40 }
 0x128   :  { %v887_v37 = vadd.f32 %v886_v49, %v885_v61  ;;  %v986_v50 = vadd.f32 %v985_v46, %v984_v30 }
 0x12a   :  { %v888_v54 = vrot.slane %v887_v37, 4  ;;  %v988_v55 = vadd.f32 %v987_v53, %v986_v50 }
 0x12c   :  { %v889_v25 = vadd.f32 %v888_v54, %v887_v37  ;;  %v989_v56 = vrot.slane %v988_v55, 4 }
 0x12e   :  { %v890_v57 = vrot.slane %v889_v25, 2  ;;  %v990_v28 = vadd.f32 %v989_v56, %v988_v55 }
 0x130   :  { %v891_v52 = vadd.f32 %v890_v57, %v889_v25  ;;  %v991_v59 = vrot.slane %v990_v28, 2 }
 0x132   :  { %v892_v62 = vrot.slane %v891_v52, 1  ;;  %v992_v0 = vadd.f32 %v991_v59, %v990_v28 }
 0x134   :  { %v993_v45 = vrot.slane %v992_v0, 1  ;;  %v893_v8 = vadd.f32 %v892_v62, %v891_v52 }
 0x136   :  { %v994_v9 = vadd.f32 %v993_v45, %v992_v0 }
 0x138   :  { %v996_v44 = vsel %vm995_vm3, %v893_v8, %v994_v9 }
 0x139   :  { %v998_v2 = vsel %vm997_vm4, %v996_v44, 0.0 }
 0x13a   :  { %999 = vst.msk [vmem:[%s1958_s5] sm:$0xff] %vm824_vm6, %v998_v2 }
 0x175   :  { %v1021_v12 = vpop.permute.xlu1 %1020 }
 0x176   :  { %v1066_v13 = vsel %vm824_vm6, %v1585_v7, %v1021_v12 }
 0x177   :  { %1082 = vst [vmem:[%s1959_s4 + $0x10] sm:$0xff] %v1066_v13  ;;  %v1017_v20 = vpop.permute.xlu0 %1016 }
 0x178   :  { %v1064_v22 = vsel %vm824_vm6, %v1590_v10, %v1017_v20 }
 0x179   :  { %1080 = vst [vmem:[%s1959_s4] sm:$0xff] %v1064_v22  ;;  %v1023_v23 = vpop.permute.xlu1 %1022 }
 0x17a   :  { %v1067_v1 = vsel %vm824_vm6, %v1597_v15, %v1023_v23 }
 0x17b   :  { %1083 = vst [vmem:[%s1959_s4 + $0x18] sm:$0xff] %v1067_v1  ;;  %v1019_v7 = vpop.permute.xlu0 %1018 }
 0x17c   :  { %v1065_v6 = vsel %vm824_vm6, %v1602_v18, %v1019_v7 }
 0x17d   :  { %1081 = vst [vmem:[%s1959_s4 + $0x8] sm:$0xff] %v1065_v6 }
 0x17f   :  { %v1029_v10 = vpop.permute.xlu0 %1028 }
 0x180   :  { %v1070_v27 = vsel %vm824_vm6, %v1610_v24, %v1029_v10 }
 0x181   :  { %1086 = vst [vmem:[%s1959_s4 + $0x30] sm:$0xff] %v1070_v27  ;;  %v1031_v15 = vpop.permute.xlu1 %1030 }
 0x182   :  { %v1071_v26 = vsel %vm824_vm6, %v1633_v43, %v1031_v15 }
 0x183   :  { %1087 = vst [vmem:[%s1959_s4 + $0x38] sm:$0xff] %v1071_v26  ;;  %v1025_v18 = vpop.permute.xlu0 %1024 }
 0x184   :  { %v1068_v29 = vsel %vm824_vm6, %v1622_v34, %v1025_v18 }
 0x185   :  { %1084 = vst [vmem:[%s1959_s4 + $0x20] sm:$0xff] %v1068_v29  ;;  %v1027_v24 = vpop.permute.xlu1 %1026 }
 0x186   :  { %v1069_v31 = vsel %vm824_vm6, %v1642_v51, %v1027_v24 }
 0x187   :  { %1085 = vst [vmem:[%s1959_s4 + $0x28] sm:$0xff] %v1069_v31  ;;  %v1037_v43 = vpop.permute.xlu0 %1036 }
 0x188   :  { %v1074_v32 = vsel %vm824_vm6, %v1655_v60, %v1037_v43 }
 0x189   :  { %1090 = vst [vmem:[%s1959_s4 + $0x50] sm:$0xff] %v1074_v32  ;;  %v1039_v34 = vpop.permute.xlu1 %1038 }
 0x18a   :  { %v1075_v21 = vsel %vm824_vm6, %v1681_v4, %v1039_v34 }
 0x18b   :  { %1091 = vst [vmem:[%s1959_s4 + $0x58] sm:$0xff] %v1075_v21  ;;  %v1033_v51 = vpop.permute.xlu0 %1032 }
 0x18c   :  { %v1072_v33 = vsel %vm824_vm6, %v1669_v14, %v1033_v51 }
 0x18d   :  { %1088 = vst [vmem:[%s1959_s4 + $0x40] sm:$0xff] %v1072_v33  ;;  %v1035_v60 = vpop.permute.xlu1 %1034 }
 0x18e   :  { %v1073_v48 = vsel %vm824_vm6, %v1690_v36, %v1035_v60 }
 0x18f   :  { %1089 = vst [vmem:[%s1959_s4 + $0x48] sm:$0xff] %v1073_v48  ;;  %v1041_v4 = vpop.permute.xlu0 %1040 }
 0x190   :  { %v1076_v5 = vsel %vm824_vm6, %v1717_v58, %v1041_v4 }
 0x191   :  { %1092 = vst [vmem:[%s1959_s4 + $0x60] sm:$0xff] %v1076_v5 }
 0x193   :  { %v1045_v14 = vpop.permute.xlu0 %1044  ;;  %v1043_v63 = vpop.permute.xlu1 %1042 }
 0x194   :  { %v1078_v38 = vsel %vm824_vm6, %v1703_v47, %v1045_v14  ;;  %v1077_v36 = vsel %vm824_vm6, %v1736_v16, %v1043_v63 }
 0x195   :  { %1094 = vst [vmem:[%s1959_s4 + $0x70] sm:$0xff] %v1078_v38  ;;  %1093 = vst [vmem:[%s1959_s4 + $0x68] sm:$0xff] %v1077_v36 }
 0x197   :  { %v1047_v58 = vpop.permute.xlu1 %1046 }
 0x198   :  { %v1079_v39 = vsel %vm824_vm6, %v1729_v19, %v1047_v58 }
 0x199   :  { %1095 = vst [vmem:[%s1959_s4 + $0x78] sm:$0xff] %v1079_v39 }

// kernel: generator3d_forward.6
= control target key start
LH: loop header
LB: loop body
LE: loop exit
PB: predicated region body
PF: predicated region fallthrough
CT: control target
= control target key end

     0   :  { %s391_s0 = inlined_call_operand.vmem [shape: f32[128,128], index: 0, kind: input, shape index: {}]   ;;  %s392_s1 = inlined_call_operand.vmem [shape: f32[1,128], index: 1, kind: input, shape index: {}]   ;;  %s393_s2 = inlined_call_operand.vmem [shape: f32[1,128], index: 2, kind: input, shape index: {}]   ;;  %s394_s3 = inlined_call_operand.vmem [shape: bf16[128,128], index: 3, kind: output, shape index: {}]  }
   0x1   :  { %v14_v0 = vld [vmem:[%s391_s0] sm:$0xff]  ;;  %v15_v1 = vld [vmem:[%s391_s0 + $0x8] sm:$0xff]  ;;  %v16_v6 = vld [vmem:[%s391_s0 + $0x10] sm:$0xff] }
   0x2   :  { %v286_v2 = vld [vmem:[%s392_s1] ss:$0 sm:$0xff]  ;;  %v17_v7 = vld [vmem:[%s391_s0 + $0x18] sm:$0xff]  ;;  %v19_v11 = vld [vmem:[%s391_s0 + $0x28] sm:$0xff] }
   0x3   :  { %v37_v3 = vmul.f32 %v286_v2, %v14_v0  ;;  %v38_v4 = vmul.f32 %v286_v2, %v15_v1  ;;  %v293_v5 = vld [vmem:[%s393_s2] ss:$0 sm:$0xff]  ;;  %v39_v8 = vmul.f32 %v286_v2, %v16_v6  ;;  %v40_v9 = vmul.f32 %v286_v2, %v17_v7  ;;  %v20_v12 = vld [vmem:[%s391_s0 + $0x30] sm:$0xff]  ;;  %v21_v17 = vld [vmem:[%s391_s0 + $0x38] sm:$0xff] }
   0x4   :  { %v18_v10 = vld [vmem:[%s391_s0 + $0x20] sm:$0xff]  ;;  %v42_v16 = vmul.f32 %v286_v2, %v19_v11  ;;  %v43_v20 = vmul.f32 %v286_v2, %v20_v12  ;;  %v44_v21 = vmul.f32 %v286_v2, %v21_v17  ;;  %v23_v27 = vld [vmem:[%s391_s0 + $0x48] sm:$0xff]  ;;  %v24_v32 = vld [vmem:[%s391_s0 + $0x50] sm:$0xff] }
   0x5   :  { %v60_v13 = vadd.f32 %v293_v5, %v37_v3  ;;  %v61_v14 = vadd.f32 %v293_v5, %v38_v4  ;;  %v41_v15 = vmul.f32 %v286_v2, %v18_v10  ;;  %v62_v18 = vadd.f32 %v293_v5, %v39_v8  ;;  %v22_v22 = vld [vmem:[%s391_s0 + $0x40] sm:$0xff]  ;;  %v25_v33 = vld [vmem:[%s391_s0 + $0x58] sm:$0xff]  ;;  %v27_v39 = vld [vmem:[%s391_s0 + $0x68] sm:$0xff] }
   0x6   :  { %v63_v19 = vadd.f32 %v293_v5, %v40_v9  ;;  %v65_v26 = vadd.f32 %v293_v5, %v42_v16  ;;  %v66_v30 = vadd.f32 %v293_v5, %v43_v20  ;;  %v67_v31 = vadd.f32 %v293_v5, %v44_v21  ;;  %v26_v38 = vld [vmem:[%s391_s0 + $0x60] sm:$0xff]  ;;  %v28_v44 = vld [vmem:[%s391_s0 + $0x70] sm:$0xff]  ;;  %v29_v49 = vld [vmem:[%s391_s0 + $0x78] sm:$0xff] }
   0x7   :  { %v76_v23 = vmax.f32 %v60_v13, 0.0  ;;  %v77_v24 = vmax.f32 %v61_v14, 0.0  ;;  %v64_v25 = vadd.f32 %v293_v5, %v41_v15  ;;  %v78_v28 = vmax.f32 %v62_v18, 0.0 }
   0x8   :  { %v79_v29 = vmax.f32 %v63_v19, 0.0  ;;  %v81_v36 = vmax.f32 %v65_v26, 0.0  ;;  %v45_v37 = vmul.f32 %v286_v2, %v22_v22  ;;  %v82_v41 = vmax.f32 %v66_v30, 0.0 }
   0x9   :  { %v213_v34 = vpack.c.bf16 %v77_v24, %v76_v23  ;;  %v80_v35 = vmax.f32 %v64_v25, 0.0  ;;  %v83_v42 = vmax.f32 %v67_v31, 0.0  ;;  %v46_v43 = vmul.f32 %v286_v2, %v23_v27 }
   0xa   :  { %v218_v40 = vpack.c.bf16 %v79_v29, %v78_v28  ;;  %v68_v46 = vadd.f32 %v293_v5, %v45_v37  ;;  %v47_v47 = vmul.f32 %v286_v2, %v24_v32  ;;  %v48_v48 = vmul.f32 %v286_v2, %v25_v33 }
   0xb   :  { %214 = vst [vmem:[%s394_s3] sm:$0xff] %v213_v34   ;;  %v223_v45 = vpack.c.bf16 %v81_v36, %v80_v35  ;;  %v228_v50 = vpack.c.bf16 %v83_v42, %v82_v41  ;;  %v69_v51 = vadd.f32 %v293_v5, %v46_v43  ;;  %v49_v52 = vmul.f32 %v286_v2, %v26_v38 }
   0xc   :  { %250 = vst [vmem:[%s394_s3 + $0x8] sm:$0xff] %v218_v40   ;;  %v50_v53 = vmul.f32 %v286_v2, %v27_v39  ;;  %v84_v54 = vmax.f32 %v68_v46, 0.0  ;;  %v70_v55 = vadd.f32 %v293_v5, %v47_v47  ;;  %v71_v56 = vadd.f32 %v293_v5, %v48_v48 }
   0xd   :  { %251 = vst [vmem:[%s394_s3 + $0x10] sm:$0xff] %v223_v45   ;;  %v51_v57 = vmul.f32 %v286_v2, %v28_v44  ;;  %252 = vst [vmem:[%s394_s3 + $0x18] sm:$0xff] %v228_v50   ;;  %v85_v58 = vmax.f32 %v69_v51, 0.0  ;;  %v72_v59 = vadd.f32 %v293_v5, %v49_v52  ;;  %v52_v61 = vmul.f32 %v286_v2, %v29_v49 }
   0xe   :  { %v73_v60 = vadd.f32 %v293_v5, %v50_v53  ;;  %v86_v62 = vmax.f32 %v70_v55, 0.0  ;;  %v87_v63 = vmax.f32 %v71_v56, 0.0 }
   0xf   :  { %v74_v0 = vadd.f32 %v293_v5, %v51_v57  ;;  %v233_v1 = vpack.c.bf16 %v85_v58, %v84_v54  ;;  %v88_v3 = vmax.f32 %v72_v59, 0.0  ;;  %v75_v6 = vadd.f32 %v293_v5, %v52_v61 }
  0x10   :  { %v89_v4 = vmax.f32 %v73_v60, 0.0  ;;  %v238_v7 = vpack.c.bf16 %v87_v63, %v86_v62 }
  0x11   :  { %v90_v8 = vmax.f32 %v74_v0, 0.0  ;;  %253 = vst [vmem:[%s394_s3 + $0x20] sm:$0xff] %v233_v1   ;;  %v91_v10 = vmax.f32 %v75_v6, 0.0 }
  0x12   :  { %v243_v9 = vpack.c.bf16 %v89_v4, %v88_v3  ;;  %254 = vst [vmem:[%s394_s3 + $0x28] sm:$0xff] %v238_v7  }
  0x13   :  { %v248_v2 = vpack.c.bf16 %v91_v10, %v90_v8 }
  0x14   :  { %255 = vst [vmem:[%s394_s3 + $0x30] sm:$0xff] %v243_v9  }
  0x15   :  { %256 = vst [vmem:[%s394_s3 + $0x38] sm:$0xff] %v248_v2  }

// kernel: generator3d_forward.7
= control target key start
LH: loop header
LB: loop body
LE: loop exit
PB: predicated region body
PF: predicated region fallthrough
CT: control target
= control target key end

     0   :  { %s984_s12 = smov 0   ;;  %s1078_s0 = inlined_call_operand.vmem [shape: bf16[1536,64], index: 0, kind: input, shape index: {}]   ;;  %s1079_s1 = inlined_call_operand.vmem [shape: bf16[64,8], index: 1, kind: input, shape index: {}]   ;;  %s1080_s2 = inlined_call_operand.vmem [shape: f32[1,128], index: 2, kind: input, shape index: {}]   ;;  %s1081_s3 = inlined_call_operand.vmem [shape: f32[96,128], index: 3, kind: output, shape index: {}]  }
   0x1 LB: > { %s772_s13 = sadd.s32 4294967295, %s947_s12   ;;  %p776_p0 = scmp.ge.s32.totalorder %s947_s12, 1  ;;  %s947_s12 = sphi %s984_s12, %s13_s12  }
   0x2   : > { %p138_p1 = scmp.lt.s32.totalorder %s947_s12, 7 }
   0x4   : > { %p139_p2 = pnand %p776_p0, %p138_p1 }
   0x5   : > { %s777_s16 = sshll.u32 (!%p139_p2), %s772_s13, 5  ;;  %s949_s27 = smov (!%p139_p2), 8  }
   0x6   : > { %142 = sbr.rel (%p139_p2) target bundleno = 432 (0x1b0), region = 32  ;;  %p163_p3 = scmp.lt.s32.totalorder (!%p139_p2), %s777_s16, 191 }
   0x7   : > { %s950_s28 = smov (!%p139_p2), 72   ;;  %s951_s29 = smov (!%p139_p2), 64  }
   0x8   : > { %s952_s30 = smov (!%p139_p2), 16   ;;  %s953_s4 = smov (!%p139_p2), 24  }
   0x9   : > { %s954_s5 = smov (!%p139_p2), 88   ;;  %s955_s6 = smov (!%p139_p2), 80  }
   0xa   : > { %s956_s7 = smov (!%p139_p2), 40   ;;  %s957_s8 = smov (!%p139_p2), 32  }
   0xb   : > { %v913_v0 = vld [vmem:[%s1079_s1 + $0x18] sm:$0xff]   ;;  %v914_v1 = vld [vmem:[%s1079_s1 + $0x10] sm:$0xff]   ;;  %s1083_s16 = smov (!%p163_p3, %s777_s16), 191  ;;  %v915_v2 = vld [vmem:[%s1079_s1 + $0x8] sm:$0xff]   ;;  %vm319_vm0 = vcmask 523264   ;;  %s958_s9 = smov 96  }
   0xc   : > { %842 = vmatprep.subr.bf16.mxu0 %v913_v0  ;;  %882 = vmatprep.subr.bf16.mxu1 %v913_v0  ;;  %s778_s21 = sshll.u32 %s1083_s16, 2  ;;  %v916_v3 = vld [vmem:[%s1079_s1] sm:$0xff]   ;;  %s959_s10 = smov 56   ;;  %vm649_vm1 = vcmask 64512   ;;  %vm652_vm2 = vcmask 130048   ;;  %vm655_vm3 = vcmask 195584  }
   0xd   : > { %843 = vmatpush3.bf16.msra.mxu0 %v913_v0  ;;  %886 = vmatpush3.bf16.msra.mxu1 %v913_v0  ;;  %s1009_s26 = scalar_lea.vmem %s1078_s0, %s778_s21  ;;  %s960_s11 = smov 48   ;;  %vm658_vm4 = vcmask 261120   ;;  %vm661_vm5 = vcmask 326656   ;;  %vm664_vm6 = vcmask 392192   ;;  %vm667_vm7 = vcmask 457728  }
   0xe   : > { %844 = vmatprep.subr.bf16.mxu0 %v914_v1  ;;  %883 = vmatprep.subr.bf16.mxu1 %v914_v1  ;;  %v917_v4 = vld [vmem:[%s1009_s26] sm:$0xff]   ;;  %v919_v6 = vld [vmem:[%s1009_s26 + $0x8] sm:$0xff]   ;;  %v921_v8 = vld [vmem:[%s1009_s26 + $0x10] sm:$0xff]   ;;  %s961_s14 = smov 104   ;;  %s962_s15 = smov 112   ;;  %vm672_vm8 = vcmask 588800  }
   0xf   : > { %v918_v5 = vld [vmem:[%s1009_s26 + $0x40] sm:$0xff]   ;;  %850 = vmatprep.mubr.msk.bf16.mxu0 %vm319_vm0, %v917_v4  ;;  %v920_v7 = vld [vmem:[%s1009_s26 + $0x48] sm:$0xff]   ;;  %v923_v9 = vld [vmem:[%s1009_s26 + $0x50] sm:$0xff]   ;;  %s963_s16 = smov 120   ;;  %vm675_vm9 = vcmask 654336   ;;  %vm678_vm10 = vcmask 719872  }
  0x10   : > { %866 = vmatprep.mubr.msk.bf16.mxu1 %vm319_vm0, %v918_v5  ;;  %v922_v10 = vld [vmem:[%s1009_s26 + $0x18] sm:$0xff]   ;;  %v925_v12 = vld [vmem:[%s1009_s26 + $0x20] sm:$0xff]   ;;  %v926_v14 = vld [vmem:[%s1009_s26 + $0x28] sm:$0xff]   ;;  %vm681_vm11 = vcmask 785408   ;;  %vm684_vm12 = vcmask 850944   ;;  %vm687_vm13 = vcmask 916480  }
  0x11   : > { %845 = vmatpush3.bf16.msra.mxu0 %v914_v1  ;;  %887 = vmatpush3.bf16.msra.mxu1 %v914_v1  ;;  %v924_v11 = vld [vmem:[%s1009_s26 + $0x58] sm:$0xff]   ;;  %v927_v13 = vld [vmem:[%s1009_s26 + $0x60] sm:$0xff]   ;;  %v928_v15 = vld [vmem:[%s1009_s26 + $0x68] sm:$0xff]   ;;  %vm690_vm14 = vcmask 982016   ;;  %s779_s19 = sshll.u32 %s772_s13, 1 }
  0x12   : > { %846 = vmatprep.subr.bf16.mxu0 %v915_v2  ;;  %884 = vmatprep.subr.bf16.mxu1 %v915_v2  ;;  %v929_v16 = vld [vmem:[%s1009_s26 + $0x30] sm:$0xff]   ;;  %v930_v18 = vld [vmem:[%s1009_s26 + $0x38] sm:$0xff]   ;;  %p169_p4 = scmp.lt.s32.totalorder %s779_s19, 11 }
  0x13   : > { %v931_v17 = vld [vmem:[%s1009_s26 + $0x70] sm:$0xff]   ;;  %v932_v19 = vld [vmem:[%s1009_s26 + $0x78] sm:$0xff]  }
  0x14   : > { %s1085_s19 = smov (!%p169_p4, %s779_s19), 11 }
  0x15   : > { %847 = vmatpush3.bf16.msra.mxu0 %v915_v2  ;;  %888 = vmatpush3.bf16.msra.mxu1 %v915_v2  ;;  %s780_s20 = sshll.u32 %s1085_s19, 3 }
  0x16   : > { %848 = vmatprep.subr.bf16.mxu0 %v916_v3  ;;  %885 = vmatprep.subr.bf16.mxu1 %v916_v3  ;;  %s172_s23 = scalar_lea.vmem %s1081_s3, %s780_s20 }
  0x19   : > { %849 = vmatpush3.bf16.msra.mxu0 %v916_v3  ;;  %889 = vmatpush3.bf16.msra.mxu1 %v916_v3 }
  0x1c   : > { %851 = vmatmul.mubr.msk.bf16.vlgmr.msra.gmra.mxu0 %vm319_vm0, %v919_v6  ;;  %867 = vmatmul.mubr.msk.bf16.vlgmr.msra.gmra.mxu1 %vm319_vm0, %v920_v7 }
  0x1d   : > { %854 = vmatprep.mubr.msk.bf16.mxu0 %vm319_vm0, %v921_v8  ;;  %870 = vmatprep.mubr.msk.bf16.mxu1 %vm319_vm0, %v923_v9 }
  0x24   : > { %855 = vmatmul.mubr.msk.bf16.gmra.mxu0 %vm319_vm0, %v922_v10  ;;  %871 = vmatmul.mubr.msk.bf16.gmra.mxu1 %vm319_vm0, %v924_v11 }
  0x25   : > { %858 = vmatprep.mubr.msk.bf16.mxu0 %vm319_vm0, %v925_v12  ;;  %874 = vmatprep.mubr.msk.bf16.mxu1 %vm319_vm0, %v927_v13 }
  0x2c   : > { %859 = vmatmul.mubr.msk.bf16.gmra.mxu0 %vm319_vm0, %v926_v14  ;;  %875 = vmatmul.mubr.msk.bf16.gmra.mxu1 %vm319_vm0, %v928_v15 }
  0x2d   : > { %862 = vmatprep.mubr.msk.bf16.mxu0 %vm319_vm0, %v929_v16  ;;  %878 = vmatprep.mubr.msk.bf16.mxu1 %vm319_vm0, %v931_v17 }
  0x34   : > { %863 = vmatmul.mubr.msk.bf16.gmra.mxu0 %vm319_vm0, %v930_v18  ;;  %879 = vmatmul.mubr.msk.bf16.gmra.mxu1 %vm319_vm0, %v932_v19 }
  0xdc   : > { %v852_v20 = vpop.f32.mrf.mxu0  ;;  %v868_v21 = vpop.f32.mrf.mxu1 }
  0xdd   : > { %531 = vrot.lane.b32.xlu0 %v852_v20, %s949_s27 }
  0xde   : > { %v1043_v22 = vpop.f32.mrf.mxu0  ;;  %v466_v23 = vpop.f32.mrf.mxu1 }
  0xe0   : > { %v853_v24 = vpop.f32.mrf.mxu0  ;;  %v869_v25 = vpop.f32.mrf.mxu1 }
  0xe1   : > { %597 = vrot.lane.b32.xlu1 %v869_v25, %s950_s28  ;;  %595 = vrot.lane.b32.xlu0 %v868_v21, %s950_s28 }
  0xe2   : > { %v1045_v26 = vpop.f32.mrf.mxu0  ;;  %v469_v27 = vpop.f32.mrf.mxu1 }
  0xe4   : > { %v856_v28 = vpop.f32.mrf.mxu0  ;;  %v872_v30 = vpop.f32.mrf.mxu1 }
  0xe5   : > { %589 = vrot.lane.b32.xlu1 %v469_v27, %s951_s29  ;;  %587 = vrot.lane.b32.xlu0 %v466_v23, %s951_s29 }
  0xe6   : > { %v418_v29 = vpop.f32.mrf.mxu0  ;;  %v482_v32 = vpop.f32.mrf.mxu1 }
  0xe8   : > { %v857_v31 = vpop.f32.mrf.mxu0  ;;  %v873_v34 = vpop.f32.mrf.mxu1 }
  0xe9   : > { %533 = vrot.lane.b32.xlu0 %v853_v24, %s949_s27  ;;  %539 = vrot.lane.b32.xlu1 %v418_v29, %s952_s30 }
  0xea   : > { %v421_v33 = vpop.f32.mrf.mxu0  ;;  %v485_v36 = vpop.f32.mrf.mxu1 }
  0xec   : > { %v860_v35 = vpop.f32.mrf.mxu0  ;;  %v876_v38 = vpop.f32.mrf.mxu1 }
  0xed   : > { %547 = vrot.lane.b32.xlu0 %v856_v28, %s953_s4  ;;  %549 = vrot.lane.b32.xlu1 %v857_v31, %s953_s4 }
  0xee   : > { %v434_v37 = vpop.f32.mrf.mxu0  ;;  %v498_v40 = vpop.f32.mrf.mxu1 }
  0xf0   : > { %v861_v39 = vpop.f32.mrf.mxu0  ;;  %v877_v42 = vpop.f32.mrf.mxu1 }
  0xf1   : > { %611 = vrot.lane.b32.xlu0 %v872_v30, %s954_s5  ;;  %613 = vrot.lane.b32.xlu1 %v873_v34, %s954_s5 }
  0xf2   : > { %v437_v41 = vpop.f32.mrf.mxu0  ;;  %v501_v44 = vpop.f32.mrf.mxu1 }
  0xf4   : > { %v864_v43 = vpop.f32.mrf.mxu0  ;;  %v880_v47 = vpop.f32.mrf.mxu1 }
  0xf5   : > { %603 = vrot.lane.b32.xlu0 %v482_v32, %s955_s6  ;;  %541 = vrot.lane.b32.xlu1 %v421_v33, %s952_s30 }
  0xf6   : > { %v450_v45 = vpop.f32.mrf.mxu0  ;;  %v514_v49 = vpop.f32.mrf.mxu1 }
  0xf8   : > { %v865_v46 = vpop.f32.mrf.mxu0  ;;  %v881_v50 = vpop.f32.mrf.mxu1 }
  0xf9   : > { %605 = vrot.lane.b32.xlu1 %v485_v36, %s955_s6  ;;  %563 = vrot.lane.b32.xlu0 %v860_v35, %s956_s7 }
  0xfa   : > { %v453_v48 = vpop.f32.mrf.mxu0  ;;  %v517_v51 = vpop.f32.mrf.mxu1 }
  0xfd   : > { %555 = vrot.lane.b32.xlu0 %v434_v37, %s957_s8  ;;  %565 = vrot.lane.b32.xlu1 %v861_v39, %s956_s7 }
 0x101   : > { %619 = vrot.lane.b32.xlu0 %v498_v40, %s958_s9  ;;  %557 = vrot.lane.b32.xlu1 %v437_v41, %s957_s8  ;;  %v817_v40 = vld [vmem:[%s1080_s2] ss:$0 sm:$0xff] }
 0x105   : > { %621 = vrot.lane.b32.xlu1 %v501_v44, %s958_s9  ;;  %579 = vrot.lane.b32.xlu0 %v864_v43, %s959_s10 }
 0x109   : > { %571 = vrot.lane.b32.xlu0 %v450_v45, %s960_s11  ;;  %581 = vrot.lane.b32.xlu1 %v865_v46, %s959_s10 }
 0x10d   : > { %627 = vrot.lane.b32.xlu0 %v876_v38, %s961_s14  ;;  %573 = vrot.lane.b32.xlu1 %v453_v48, %s960_s11 }
 0x111   : > { %635 = vrot.lane.b32.xlu0 %v514_v49, %s962_s15  ;;  %629 = vrot.lane.b32.xlu1 %v877_v42, %s961_s14 }
 0x115   : > { %643 = vrot.lane.b32.xlu0 %v880_v47, %s963_s16  ;;  %637 = vrot.lane.b32.xlu1 %v517_v51, %s962_s15 }
 0x119   : > { %645 = vrot.lane.b32.xlu1 %v881_v50, %s963_s16 }
 0x14f   : > { %v532_v52 = vpop.permute.xlu0 %531 }
 0x150   : > { %v650_v7 = vsel %vm649_vm1, %v1043_v22, %v532_v52 }
 0x153   : > { %v598_v53 = vpop.permute.xlu1 %597  ;;  %v596_v54 = vpop.permute.xlu0 %595 }
 0x157   : > { %v590_v55 = vpop.permute.xlu1 %589  ;;  %v588_v56 = vpop.permute.xlu0 %587 }
 0x15b   : > { %v534_v57 = vpop.permute.xlu0 %533  ;;  %v540_v58 = vpop.permute.xlu1 %539 }
 0x15c   : > { %v653_v8 = vsel %vm652_vm2, %v650_v7, %v540_v58  ;;  %v651_v9 = vsel %vm649_vm1, %v1045_v26, %v534_v57 }
 0x15f   : > { %v548_v59 = vpop.permute.xlu0 %547  ;;  %v550_v60 = vpop.permute.xlu1 %549 }
 0x160   : > { %v656_v10 = vsel %vm655_vm3, %v653_v8, %v548_v59 }
 0x163   : > { %v612_v61 = vpop.permute.xlu0 %611  ;;  %v614_v62 = vpop.permute.xlu1 %613 }
 0x167   : > { %v604_v63 = vpop.permute.xlu0 %603  ;;  %v542_v0 = vpop.permute.xlu1 %541 }
 0x168   : > { %v654_v13 = vsel %vm652_vm2, %v651_v9, %v542_v0 }
 0x169   : > { %v657_v15 = vsel %vm655_vm3, %v654_v13, %v550_v60 }
 0x16b   : > { %v606_v1 = vpop.permute.xlu1 %605  ;;  %v564_v2 = vpop.permute.xlu0 %563 }
 0x16f   : > { %v556_v3 = vpop.permute.xlu0 %555  ;;  %v566_v4 = vpop.permute.xlu1 %565 }
 0x170   : > { %v659_v14 = vsel %vm658_vm4, %v656_v10, %v556_v3 }
 0x171   : > { %v662_v16 = vsel %vm661_vm5, %v659_v14, %v564_v2 }
 0x173   : > { %v620_v5 = vpop.permute.xlu0 %619  ;;  %v558_v6 = vpop.permute.xlu1 %557 }
 0x174   : > { %v660_v19 = vsel %vm658_vm4, %v657_v15, %v558_v6 }
 0x175   : > { %v663_v25 = vsel %vm661_vm5, %v660_v19, %v566_v4 }
 0x177   : > { %v622_v11 = vpop.permute.xlu1 %621  ;;  %v580_v12 = vpop.permute.xlu0 %579 }
 0x17b   : > { %v572_v17 = vpop.permute.xlu0 %571  ;;  %v582_v18 = vpop.permute.xlu1 %581 }
 0x17c   : > { %v665_v20 = vsel %vm664_vm6, %v662_v16, %v572_v17 }
 0x17d   : > { %v668_v21 = vsel %vm667_vm7, %v665_v20, %v580_v12 }
 0x17e   : > { %v670_v22 = vsel %vm319_vm0, %v668_v21, %v588_v56 }
 0x17f   : > { %v673_v23 = vsel %vm672_vm8, %v670_v22, %v596_v54  ;;  %v628_v24 = vpop.permute.xlu0 %627  ;;  %v574_v26 = vpop.permute.xlu1 %573 }
 0x180   : > { %v676_v27 = vsel %vm675_vm9, %v673_v23, %v604_v63  ;;  %v666_v28 = vsel %vm664_vm6, %v663_v25, %v574_v26 }
 0x181   : > { %v679_v29 = vsel %vm678_vm10, %v676_v27, %v612_v61  ;;  %v669_v30 = vsel %vm667_vm7, %v666_v28, %v582_v18 }
 0x182   : > { %v682_v31 = vsel %vm681_vm11, %v679_v29, %v620_v5  ;;  %v671_v32 = vsel %vm319_vm0, %v669_v30, %v590_v55 }
 0x183   : > { %v674_v33 = vsel %vm672_vm8, %v671_v32, %v598_v53  ;;  %v636_v34 = vpop.permute.xlu0 %635  ;;  %v630_v35 = vpop.permute.xlu1 %629  ;;  %v685_v36 = vsel %vm684_vm12, %v682_v31, %v628_v24 }
 0x184   : > { %v677_v37 = vsel %vm675_vm9, %v674_v33, %v606_v1  ;;  %v688_v41 = vsel %vm687_vm13, %v685_v36, %v636_v34 }
 0x185   : > { %v680_v38 = vsel %vm678_vm10, %v677_v37, %v614_v62 }
 0x186   : > { %v683_v39 = vsel %vm681_vm11, %v680_v38, %v622_v11 }
 0x187   : > { %v644_v42 = vpop.permute.xlu0 %643  ;;  %v638_v43 = vpop.permute.xlu1 %637  ;;  %v686_v44 = vsel %vm684_vm12, %v683_v39, %v630_v35 }
 0x188   : > { %v691_v45 = vsel %vm690_vm14, %v688_v41, %v644_v42  ;;  %v689_v48 = vsel %vm687_vm13, %v686_v44, %v638_v43 }
 0x189   : > { %v700_v46 = vadd.f32 %v817_v40, %v691_v45 }
 0x18b   : > { %v818_v47 = vmul.f32 -1.442695, %v700_v46  ;;  %v646_v49 = vpop.permute.xlu1 %645 }
 0x18c   : > { %v692_v50 = vsel %vm690_vm14, %v689_v48, %v646_v49 }
 0x18d   : > { %933 = vpow2.f32 %v818_v47  ;;  %v701_v51 = vadd.f32 %v817_v40, %v692_v50 }
 0x18f   : > { %v819_v52 = vmul.f32 -1.442695, %v701_v51 }
 0x191   : > { %935 = vpow2.f32 %v819_v52 }
 0x19a   : > { %v934_v53 = vpop.eup %933 }
 0x19b   : > { %v708_v54 = vadd.f32 1.0, %v934_v53 }
 0x19d   : > { %937 = vrcp.f32 %v708_v54 }
 0x19e   : > { %v936_v55 = vpop.eup %935 }
 0x19f   : > { %v709_v56 = vadd.f32 1.0, %v936_v55 }
 0x1a1   : > { %939 = vrcp.f32 %v709_v56 }
 0x1aa   : > { %v938_v57 = vpop.eup %937 }
 0x1ab   : > { %714 = vst [vmem:[%s172_s23] sm:$0xff] %v938_v57 }
 0x1ae   : > { %v940_v58 = vpop.eup %939 }
 0x1af   : > { %715 = vst [vmem:[%s172_s23 + $0x8] sm:$0xff] %v940_v58 }
 0x1b0 PF: > { %s13_s12 = sadd.s32 1, %s947_s12  }
 0x1b1   : > { %p10_p5 = scmp.ge.s32.totalorder %s13_s12, 8  }
 0x1b3   :  { %12 = sbr.rel (!%p10_p5) target bundleno = 1 (0x1), region = 62 }

</bundles_post_ra>
